<compile_context>
chip_gen: v7x
topology: tpu7x:2x2x1
jax: 0.10.0
libtpu: 0.0.40
codegen_flags: <defaults>
</compile_context>

<pallas_src>
import functools

import jax
import jax.numpy as jnp
from jax.experimental import pallas as pl
from jax.experimental.pallas import tpu as pltpu

NUM_HEADS = 8


def _msmha_kernel(x_ref, pe_ref, wqkv_ref, bqkv_ref, o_ref, *, num_heads, head_dim):
    # x_ref : (Bb, S, D) f32   pe_ref : (S, D) f32
    # wqkv_ref : (D, 3D) bf16  (= [sm_scale*Wq^T | Wk^T | Wv^T])
    # bqkv_ref : (1, 3D) f32   (= [sm_scale*bq | bk | bv])
    Bb, S, D = x_ref.shape
    Dh = head_dim

    # Position-encoding add in f32, then flatten (Bb, S) rows for one fused matmul.
    x = x_ref[...] + pe_ref[...]                       # (Bb, S, D), broadcast over Bb
    x2 = x.reshape(Bb * S, D).astype(jnp.bfloat16)     # leading-dim merge only

    # Single fused QKV projection: (Bb*S, D) @ (D, 3D) on the MXU, f32 accumulate.
    qkv = jnp.dot(x2, wqkv_ref[...], preferred_element_type=jnp.float32)
    qkv = qkv + bqkv_ref[...]                          # (Bb*S, 3D) f32
    qkv_b = qkv.astype(jnp.bfloat16)                   # single bf16 copy for the MXU

    head_outs = []
    for h in range(num_heads):                         # static unroll over heads only;
        c = h * Dh                                     # batch dim stays vectorized below
        qh = qkv_b[:, c:c + Dh].reshape(Bb, S, Dh)             # (Bb, S, Dh) bf16
        kh = qkv_b[:, D + c:D + c + Dh].reshape(Bb, S, Dh)     # (Bb, S, Dh) bf16
        vh = qkv_b[:, 2 * D + c:2 * D + c + Dh].reshape(Bb, S, Dh)

        # Batched q @ k^T over the block-batch dim (no explicit transpose).
        s = jnp.einsum('bqd,bkd->bqk', qh, kh,
                       preferred_element_type=jnp.float32)     # (Bb, S, S) f32
        s = s - jnp.max(s, axis=-1, keepdims=True)
        p = jnp.exp(s)
        denom = jnp.sum(p, axis=-1, keepdims=True)             # (Bb, S, 1) f32
        # dropout: identity (eval mode)
        oh = jnp.einsum('bqk,bkd->bqd', p.astype(jnp.bfloat16), vh,
                        preferred_element_type=jnp.float32)    # (Bb, S, Dh) f32
        # Flash-style normalization: O(S*Dh) multiplies instead of O(S*S).
        head_outs.append(oh * pl.reciprocal(denom, approx=True))

    # Assemble once and store with a single lane-dense write (no masked per-head vst).
    o_ref[...] = jnp.concatenate(head_outs, axis=-1).astype(o_ref.dtype)


def fuse_qkv_params(wq, wk, wv, bq, bk, bv, *, sm_scale):
    """Build the fused projection params ONCE (outside the per-call path).

    sm_scale is folded into the Wq columns / bq so the kernel never scales q.
    """
    wqkv_t = jnp.concatenate(
        [wq.T * sm_scale, wk.T, wv.T], axis=1).astype(jnp.bfloat16)            # (D, 3D)
    bqkv = jnp.concatenate([bq * sm_scale, bk, bv])[None, :].astype(jnp.float32)  # (1, 3D)
    return wqkv_t, bqkv


def msmha_pallas(x, pe, wqkv_t, bqkv, *, num_heads=NUM_HEADS, block_batch=None):
    B, S, D = x.shape
    head_dim = D // num_heads
    assert head_dim * num_heads == D

    if block_batch is None:
        # Fill ~256 fused-matmul rows per grid step (256-wide MXU on v6e/v7x).
        # At small shapes this yields a SINGLE grid step: the ~0.35us/step fixed
        # cost dominates on 1-TC v5e/v6e, and splitting for v7x's 2 TCs only pays
        # when each step has >= ~256 rows of work.
        block_batch = min(B, max(1, 256 // max(S, 1)))
    while B % block_batch:
        block_batch -= 1
    grid = (B // block_batch,)

    kernel = functools.partial(
        _msmha_kernel, num_heads=num_heads, head_dim=head_dim,
    )

    # Per-step VMEM footprint is tiny for these shapes (< 1 MiB), so the default
    # scoped VMEM limit is fine on v5e/v6e/v7x.
    return pl.pallas_call(
        kernel,
        out_shape=jax.ShapeDtypeStruct((B, S, D), jnp.float32),
        grid=grid,
        in_specs=[
            pl.BlockSpec((block_batch, S, D), lambda b: (b, 0, 0)),   # x
            pl.BlockSpec((S, D), lambda b: (0, 0)),                   # position encoding
            pl.BlockSpec((D, 3 * D), lambda b: (0, 0)),               # fused Wqkv^T (bf16)
            pl.BlockSpec((1, 3 * D), lambda b: (0, 0)),               # fused bias
        ],
        out_specs=pl.BlockSpec((block_batch, S, D), lambda b: (b, 0, 0)),
        compiler_params=pltpu.CompilerParams(dimension_semantics=("parallel",)),
    )(x, pe, wqkv_t, bqkv)


def sinusoidal_pe(seq_len, dim):
    # Exactly mirrors the PyTorch construction (sin half concatenated with cos half).
    pos = jnp.arange(seq_len, dtype=jnp.float32)[:, None]                       # (S, 1)
    div = 10000.0 ** (jnp.arange(0, dim, 2, dtype=jnp.float32) / float(dim))    # (D/2,)
    ang = pos / div                                                             # (S, D/2)
    return jnp.concatenate([jnp.sin(ang), jnp.cos(ang)], axis=-1)               # (S, D)


def msmha_reference(x, pe, wq, wk, wv, bq, bk, bv, *, num_heads=NUM_HEADS):
    # Pure-JAX f32 reference of the PyTorch forward (dropout = identity).
    B, S, D = x.shape
    Dh = D // num_heads
    xp = x + pe[None]
    q = xp @ wq.T + bq
    k = xp @ wk.T + bk
    v = xp @ wv.T + bv
    qh = q.reshape(B, S, num_heads, Dh).transpose(0, 2, 1, 3)
    kh = k.reshape(B, S, num_heads, Dh).transpose(0, 2, 1, 3)
    vh = v.reshape(B, S, num_heads, Dh).transpose(0, 2, 1, 3)
    scores = jnp.einsum("bhqd,bhkd->bhqk", qh, kh) * (Dh ** -0.5)
    w = jax.nn.softmax(scores, axis=-1)
    out = jnp.einsum("bhqk,bhkd->bhqd", w, vh)
    return out.transpose(0, 2, 1, 3).reshape(B, S, D)


if __name__ == "__main__":
    B, S, D = 2, 8, 32          # batch, seq_length, input_dim (input_dim % num_heads == 0)
    head_dim = D // NUM_HEADS
    sm_scale = float(head_dim) ** (-0.5)

    key = jax.random.PRNGKey(0)
    kx, kq, kk, kv, kbq, kbk, kbv = jax.random.split(key, 7)

    x = jax.random.normal(kx, (B, S, D), dtype=jnp.float32)
    # nn.Linear(input_dim, input_dim): weight (D, D), bias (D,)
    wq = jax.random.normal(kq, (D, D), dtype=jnp.float32) * (D ** -0.5)
    wk = jax.random.normal(kk, (D, D), dtype=jnp.float32) * (D ** -0.5)
    wv = jax.random.normal(kv, (D, D), dtype=jnp.float32) * (D ** -0.5)
    bq = jax.random.normal(kbq, (D,), dtype=jnp.float32) * 0.02
    bk = jax.random.normal(kbk, (D,), dtype=jnp.float32) * 0.02
    bv = jax.random.normal(kbv, (D,), dtype=jnp.float32) * 0.02

    pe = sinusoidal_pe(S, D)

    # Fuse QKV weights/biases once, outside the per-call path (sm_scale folded in).
    wqkv_t, bqkv = fuse_qkv_params(wq, wk, wv, bq, bk, bv, sm_scale=sm_scale)

    out = msmha_pallas(x, pe, wqkv_t, bqkv)
    out = jax.block_until_ready(out)

    ref = msmha_reference(x, pe, wq, wk, wv, bq, bk, bv)
    assert out.shape == (B, S, D)
    # bf16 MXU operands + approx reciprocal => compare against the f32 reference
    # with a correspondingly relaxed tolerance.
    assert jnp.allclose(out, ref, atol=5e-2, rtol=5e-2), "mismatch vs JAX reference"

    print("KERNEL_OK")
</pallas_src>

<mosaic_0001>
module attributes {stable_mosaic.version = 11 : i64} {
  func.func @_msmha_kernel(%arg0: i32, %arg1: memref<2x8x32xf32, #tpu.memory_space<vmem>>, %arg2: memref<8x32xf32, #tpu.memory_space<vmem>>, %arg3: memref<32x96xbf16, #tpu.memory_space<vmem>>, %arg4: memref<1x96xf32, #tpu.memory_space<vmem>>, %arg5: memref<2x8x32xf32, #tpu.memory_space<vmem>>) attributes {dimension_semantics = [#tpu.dimension_semantics<parallel>], iteration_bounds = array<i64: 1>, scalar_prefetch = 0 : i64, scratch_operands = 0 : i64, tpu.core_type = #tpu.core_type<tc>, window_params = [{transform_indices = @transform_0, window_bounds = array<i64: 2, 8, 32>}, {pipeline_mode = #tpu.pipeline_mode<synchronous>, transform_indices = @transform_1, window_bounds = array<i64: 8, 32>}, {pipeline_mode = #tpu.pipeline_mode<synchronous>, transform_indices = @transform_2, window_bounds = array<i64: 32, 96>}, {pipeline_mode = #tpu.pipeline_mode<synchronous>, transform_indices = @transform_3, window_bounds = array<i64: 1, 96>}, {transform_indices = @transform_4, window_bounds = array<i64: 2, 8, 32>}]} {
    %c0 = arith.constant 0 : index
    %c0_0 = arith.constant 0 : index
    %c0_1 = arith.constant 0 : index
    %0 = vector.load %arg1[%c0, %c0_0, %c0_1] : memref<2x8x32xf32, #tpu.memory_space<vmem>>, vector<2x8x32xf32>
    %c0_2 = arith.constant 0 : index
    %c0_3 = arith.constant 0 : index
    %1 = vector.load %arg2[%c0_2, %c0_3] : memref<8x32xf32, #tpu.memory_space<vmem>>, vector<8x32xf32>
    %2 = vector.shape_cast %1 : vector<8x32xf32> to vector<1x8x32xf32>
    %3 = vector.broadcast %2 : vector<1x8x32xf32> to vector<2x8x32xf32>
    %4 = arith.addf %0, %3 : vector<2x8x32xf32>
    %5 = vector.shape_cast %4 : vector<2x8x32xf32> to vector<16x32xf32>
    %6 = arith.truncf %5 : vector<16x32xf32> to vector<16x32xbf16>
    %c0_4 = arith.constant 0 : index
    %c0_5 = arith.constant 0 : index
    %7 = vector.load %arg3[%c0_4, %c0_5] : memref<32x96xbf16, #tpu.memory_space<vmem>>, vector<32x96xbf16>
    %cst = arith.constant dense<0.000000e+00> : vector<16x96xf32>
    %8 = tpu.matmul %6, %7, %cst {dimension_numbers = #tpu.dot_dimension_numbers<[1], [0], [0], [1], [0, 0, 1, 1], [], []>} : vector<16x32xbf16>, vector<32x96xbf16>, vector<16x96xf32> -> vector<16x96xf32>
    %c0_6 = arith.constant 0 : index
    %c0_7 = arith.constant 0 : index
    %9 = vector.load %arg4[%c0_6, %c0_7] : memref<1x96xf32, #tpu.memory_space<vmem>>, vector<1x96xf32>
    %10 = vector.broadcast %9 : vector<1x96xf32> to vector<16x96xf32>
    %11 = arith.addf %8, %10 : vector<16x96xf32>
    %12 = arith.truncf %11 : vector<16x96xf32> to vector<16x96xbf16>
    %13 = vector.extract_strided_slice %12 {offsets = [0, 0], sizes = [16, 4], strides = [1, 1]} : vector<16x96xbf16> to vector<16x4xbf16>
    %14 = vector.shape_cast %13 : vector<16x4xbf16> to vector<2x8x4xbf16>
    %15 = vector.extract_strided_slice %12 {offsets = [0, 32], sizes = [16, 4], strides = [1, 1]} : vector<16x96xbf16> to vector<16x4xbf16>
    %16 = vector.shape_cast %15 : vector<16x4xbf16> to vector<2x8x4xbf16>
    %17 = vector.extract_strided_slice %12 {offsets = [0, 64], sizes = [16, 4], strides = [1, 1]} : vector<16x96xbf16> to vector<16x4xbf16>
    %18 = vector.shape_cast %17 : vector<16x4xbf16> to vector<2x8x4xbf16>
    "tpu.trace_start"() <{level = 10 : i32, message = "bqd,bkd->bqk"}> : () -> ()
    %cst_8 = arith.constant dense<0.000000e+00> : vector<2x8x8xf32>
    %19 = tpu.matmul %14, %16, %cst_8 {dimension_numbers = #tpu.dot_dimension_numbers<[2], [2], [1], [1], [0, 0, 0, 1, 1, 1], [0], [0]>} : vector<2x8x4xbf16>, vector<2x8x4xbf16>, vector<2x8x8xf32> -> vector<2x8x8xf32>
    "tpu.trace_stop"() : () -> ()
    %cst_9 = arith.constant dense<0xFF800000> : vector<2x8xf32>
    %20 = vector.multi_reduction <maximumf>, %19, %cst_9 [2] : vector<2x8x8xf32> to vector<2x8xf32>
    %21 = vector.shape_cast %20 : vector<2x8xf32> to vector<2x8x1xf32>
    %22 = vector.broadcast %21 : vector<2x8x1xf32> to vector<2x8x8xf32>
    %23 = arith.subf %19, %22 : vector<2x8x8xf32>
    %24 = math.exp %23 : vector<2x8x8xf32>
    %cst_10 = arith.constant dense<0.000000e+00> : vector<2x8xf32>
    %25 = vector.multi_reduction <add>, %24, %cst_10 [2] : vector<2x8x8xf32> to vector<2x8xf32>
    %26 = vector.shape_cast %25 : vector<2x8xf32> to vector<2x8x1xf32>
    %27 = arith.truncf %24 : vector<2x8x8xf32> to vector<2x8x8xbf16>
    "tpu.trace_start"() <{level = 10 : i32, message = "bqk,bkd->bqd"}> : () -> ()
    %cst_11 = arith.constant dense<0.000000e+00> : vector<2x8x4xf32>
    %28 = tpu.matmul %27, %18, %cst_11 {dimension_numbers = #tpu.dot_dimension_numbers<[2], [1], [1], [2], [0, 0, 0, 1, 1, 2], [0], [0]>} : vector<2x8x8xbf16>, vector<2x8x4xbf16>, vector<2x8x4xf32> -> vector<2x8x4xf32>
    "tpu.trace_stop"() : () -> ()
    %29 = tpu.reciprocal %26 {approx = true} : vector<2x8x1xf32> -> vector<2x8x1xf32>
    %30 = vector.broadcast %29 : vector<2x8x1xf32> to vector<2x8x4xf32>
    %31 = arith.mulf %28, %30 : vector<2x8x4xf32>
    %32 = vector.extract_strided_slice %12 {offsets = [0, 4], sizes = [16, 4], strides = [1, 1]} : vector<16x96xbf16> to vector<16x4xbf16>
    %33 = vector.shape_cast %32 : vector<16x4xbf16> to vector<2x8x4xbf16>
    %34 = vector.extract_strided_slice %12 {offsets = [0, 36], sizes = [16, 4], strides = [1, 1]} : vector<16x96xbf16> to vector<16x4xbf16>
    %35 = vector.shape_cast %34 : vector<16x4xbf16> to vector<2x8x4xbf16>
    %36 = vector.extract_strided_slice %12 {offsets = [0, 68], sizes = [16, 4], strides = [1, 1]} : vector<16x96xbf16> to vector<16x4xbf16>
    %37 = vector.shape_cast %36 : vector<16x4xbf16> to vector<2x8x4xbf16>
    "tpu.trace_start"() <{level = 10 : i32, message = "bqd,bkd->bqk"}> : () -> ()
    %cst_12 = arith.constant dense<0.000000e+00> : vector<2x8x8xf32>
    %38 = tpu.matmul %33, %35, %cst_12 {dimension_numbers = #tpu.dot_dimension_numbers<[2], [2], [1], [1], [0, 0, 0, 1, 1, 1], [0], [0]>} : vector<2x8x4xbf16>, vector<2x8x4xbf16>, vector<2x8x8xf32> -> vector<2x8x8xf32>
    "tpu.trace_stop"() : () -> ()
    %cst_13 = arith.constant dense<0xFF800000> : vector<2x8xf32>
    %39 = vector.multi_reduction <maximumf>, %38, %cst_13 [2] : vector<2x8x8xf32> to vector<2x8xf32>
    %40 = vector.shape_cast %39 : vector<2x8xf32> to vector<2x8x1xf32>
    %41 = vector.broadcast %40 : vector<2x8x1xf32> to vector<2x8x8xf32>
    %42 = arith.subf %38, %41 : vector<2x8x8xf32>
    %43 = math.exp %42 : vector<2x8x8xf32>
    %cst_14 = arith.constant dense<0.000000e+00> : vector<2x8xf32>
    %44 = vector.multi_reduction <add>, %43, %cst_14 [2] : vector<2x8x8xf32> to vector<2x8xf32>
    %45 = vector.shape_cast %44 : vector<2x8xf32> to vector<2x8x1xf32>
    %46 = arith.truncf %43 : vector<2x8x8xf32> to vector<2x8x8xbf16>
    "tpu.trace_start"() <{level = 10 : i32, message = "bqk,bkd->bqd"}> : () -> ()
    %cst_15 = arith.constant dense<0.000000e+00> : vector<2x8x4xf32>
    %47 = tpu.matmul %46, %37, %cst_15 {dimension_numbers = #tpu.dot_dimension_numbers<[2], [1], [1], [2], [0, 0, 0, 1, 1, 2], [0], [0]>} : vector<2x8x8xbf16>, vector<2x8x4xbf16>, vector<2x8x4xf32> -> vector<2x8x4xf32>
    "tpu.trace_stop"() : () -> ()
    %48 = tpu.reciprocal %45 {approx = true} : vector<2x8x1xf32> -> vector<2x8x1xf32>
    %49 = vector.broadcast %48 : vector<2x8x1xf32> to vector<2x8x4xf32>
    %50 = arith.mulf %47, %49 : vector<2x8x4xf32>
    %51 = vector.extract_strided_slice %12 {offsets = [0, 8], sizes = [16, 4], strides = [1, 1]} : vector<16x96xbf16> to vector<16x4xbf16>
    %52 = vector.shape_cast %51 : vector<16x4xbf16> to vector<2x8x4xbf16>
    %53 = vector.extract_strided_slice %12 {offsets = [0, 40], sizes = [16, 4], strides = [1, 1]} : vector<16x96xbf16> to vector<16x4xbf16>
    %54 = vector.shape_cast %53 : vector<16x4xbf16> to vector<2x8x4xbf16>
    %55 = vector.extract_strided_slice %12 {offsets = [0, 72], sizes = [16, 4], strides = [1, 1]} : vector<16x96xbf16> to vector<16x4xbf16>
    %56 = vector.shape_cast %55 : vector<16x4xbf16> to vector<2x8x4xbf16>
    "tpu.trace_start"() <{level = 10 : i32, message = "bqd,bkd->bqk"}> : () -> ()
    %cst_16 = arith.constant dense<0.000000e+00> : vector<2x8x8xf32>
    %57 = tpu.matmul %52, %54, %cst_16 {dimension_numbers = #tpu.dot_dimension_numbers<[2], [2], [1], [1], [0, 0, 0, 1, 1, 1], [0], [0]>} : vector<2x8x4xbf16>, vector<2x8x4xbf16>, vector<2x8x8xf32> -> vector<2x8x8xf32>
    "tpu.trace_stop"() : () -> ()
    %cst_17 = arith.constant dense<0xFF800000> : vector<2x8xf32>
    %58 = vector.multi_reduction <maximumf>, %57, %cst_17 [2] : vector<2x8x8xf32> to vector<2x8xf32>
    %59 = vector.shape_cast %58 : vector<2x8xf32> to vector<2x8x1xf32>
    %60 = vector.broadcast %59 : vector<2x8x1xf32> to vector<2x8x8xf32>
    %61 = arith.subf %57, %60 : vector<2x8x8xf32>
    %62 = math.exp %61 : vector<2x8x8xf32>
    %cst_18 = arith.constant dense<0.000000e+00> : vector<2x8xf32>
    %63 = vector.multi_reduction <add>, %62, %cst_18 [2] : vector<2x8x8xf32> to vector<2x8xf32>
    %64 = vector.shape_cast %63 : vector<2x8xf32> to vector<2x8x1xf32>
    %65 = arith.truncf %62 : vector<2x8x8xf32> to vector<2x8x8xbf16>
    "tpu.trace_start"() <{level = 10 : i32, message = "bqk,bkd->bqd"}> : () -> ()
    %cst_19 = arith.constant dense<0.000000e+00> : vector<2x8x4xf32>
    %66 = tpu.matmul %65, %56, %cst_19 {dimension_numbers = #tpu.dot_dimension_numbers<[2], [1], [1], [2], [0, 0, 0, 1, 1, 2], [0], [0]>} : vector<2x8x8xbf16>, vector<2x8x4xbf16>, vector<2x8x4xf32> -> vector<2x8x4xf32>
    "tpu.trace_stop"() : () -> ()
    %67 = tpu.reciprocal %64 {approx = true} : vector<2x8x1xf32> -> vector<2x8x1xf32>
    %68 = vector.broadcast %67 : vector<2x8x1xf32> to vector<2x8x4xf32>
    %69 = arith.mulf %66, %68 : vector<2x8x4xf32>
    %70 = vector.extract_strided_slice %12 {offsets = [0, 12], sizes = [16, 4], strides = [1, 1]} : vector<16x96xbf16> to vector<16x4xbf16>
    %71 = vector.shape_cast %70 : vector<16x4xbf16> to vector<2x8x4xbf16>
    %72 = vector.extract_strided_slice %12 {offsets = [0, 44], sizes = [16, 4], strides = [1, 1]} : vector<16x96xbf16> to vector<16x4xbf16>
    %73 = vector.shape_cast %72 : vector<16x4xbf16> to vector<2x8x4xbf16>
    %74 = vector.extract_strided_slice %12 {offsets = [0, 76], sizes = [16, 4], strides = [1, 1]} : vector<16x96xbf16> to vector<16x4xbf16>
    %75 = vector.shape_cast %74 : vector<16x4xbf16> to vector<2x8x4xbf16>
    "tpu.trace_start"() <{level = 10 : i32, message = "bqd,bkd->bqk"}> : () -> ()
    %cst_20 = arith.constant dense<0.000000e+00> : vector<2x8x8xf32>
    %76 = tpu.matmul %71, %73, %cst_20 {dimension_numbers = #tpu.dot_dimension_numbers<[2], [2], [1], [1], [0, 0, 0, 1, 1, 1], [0], [0]>} : vector<2x8x4xbf16>, vector<2x8x4xbf16>, vector<2x8x8xf32> -> vector<2x8x8xf32>
    "tpu.trace_stop"() : () -> ()
    %cst_21 = arith.constant dense<0xFF800000> : vector<2x8xf32>
    %77 = vector.multi_reduction <maximumf>, %76, %cst_21 [2] : vector<2x8x8xf32> to vector<2x8xf32>
    %78 = vector.shape_cast %77 : vector<2x8xf32> to vector<2x8x1xf32>
    %79 = vector.broadcast %78 : vector<2x8x1xf32> to vector<2x8x8xf32>
    %80 = arith.subf %76, %79 : vector<2x8x8xf32>
    %81 = math.exp %80 : vector<2x8x8xf32>
    %cst_22 = arith.constant dense<0.000000e+00> : vector<2x8xf32>
    %82 = vector.multi_reduction <add>, %81, %cst_22 [2] : vector<2x8x8xf32> to vector<2x8xf32>
    %83 = vector.shape_cast %82 : vector<2x8xf32> to vector<2x8x1xf32>
    %84 = arith.truncf %81 : vector<2x8x8xf32> to vector<2x8x8xbf16>
    "tpu.trace_start"() <{level = 10 : i32, message = "bqk,bkd->bqd"}> : () -> ()
    %cst_23 = arith.constant dense<0.000000e+00> : vector<2x8x4xf32>
    %85 = tpu.matmul %84, %75, %cst_23 {dimension_numbers = #tpu.dot_dimension_numbers<[2], [1], [1], [2], [0, 0, 0, 1, 1, 2], [0], [0]>} : vector<2x8x8xbf16>, vector<2x8x4xbf16>, vector<2x8x4xf32> -> vector<2x8x4xf32>
    "tpu.trace_stop"() : () -> ()
    %86 = tpu.reciprocal %83 {approx = true} : vector<2x8x1xf32> -> vector<2x8x1xf32>
    %87 = vector.broadcast %86 : vector<2x8x1xf32> to vector<2x8x4xf32>
    %88 = arith.mulf %85, %87 : vector<2x8x4xf32>
    %89 = vector.extract_strided_slice %12 {offsets = [0, 16], sizes = [16, 4], strides = [1, 1]} : vector<16x96xbf16> to vector<16x4xbf16>
    %90 = vector.shape_cast %89 : vector<16x4xbf16> to vector<2x8x4xbf16>
    %91 = vector.extract_strided_slice %12 {offsets = [0, 48], sizes = [16, 4], strides = [1, 1]} : vector<16x96xbf16> to vector<16x4xbf16>
    %92 = vector.shape_cast %91 : vector<16x4xbf16> to vector<2x8x4xbf16>
    %93 = vector.extract_strided_slice %12 {offsets = [0, 80], sizes = [16, 4], strides = [1, 1]} : vector<16x96xbf16> to vector<16x4xbf16>
    %94 = vector.shape_cast %93 : vector<16x4xbf16> to vector<2x8x4xbf16>
    "tpu.trace_start"() <{level = 10 : i32, message = "bqd,bkd->bqk"}> : () -> ()
    %cst_24 = arith.constant dense<0.000000e+00> : vector<2x8x8xf32>
    %95 = tpu.matmul %90, %92, %cst_24 {dimension_numbers = #tpu.dot_dimension_numbers<[2], [2], [1], [1], [0, 0, 0, 1, 1, 1], [0], [0]>} : vector<2x8x4xbf16>, vector<2x8x4xbf16>, vector<2x8x8xf32> -> vector<2x8x8xf32>
    "tpu.trace_stop"() : () -> ()
    %cst_25 = arith.constant dense<0xFF800000> : vector<2x8xf32>
    %96 = vector.multi_reduction <maximumf>, %95, %cst_25 [2] : vector<2x8x8xf32> to vector<2x8xf32>
    %97 = vector.shape_cast %96 : vector<2x8xf32> to vector<2x8x1xf32>
    %98 = vector.broadcast %97 : vector<2x8x1xf32> to vector<2x8x8xf32>
    %99 = arith.subf %95, %98 : vector<2x8x8xf32>
    %100 = math.exp %99 : vector<2x8x8xf32>
    %cst_26 = arith.constant dense<0.000000e+00> : vector<2x8xf32>
    %101 = vector.multi_reduction <add>, %100, %cst_26 [2] : vector<2x8x8xf32> to vector<2x8xf32>
    %102 = vector.shape_cast %101 : vector<2x8xf32> to vector<2x8x1xf32>
    %103 = arith.truncf %100 : vector<2x8x8xf32> to vector<2x8x8xbf16>
    "tpu.trace_start"() <{level = 10 : i32, message = "bqk,bkd->bqd"}> : () -> ()
    %cst_27 = arith.constant dense<0.000000e+00> : vector<2x8x4xf32>
    %104 = tpu.matmul %103, %94, %cst_27 {dimension_numbers = #tpu.dot_dimension_numbers<[2], [1], [1], [2], [0, 0, 0, 1, 1, 2], [0], [0]>} : vector<2x8x8xbf16>, vector<2x8x4xbf16>, vector<2x8x4xf32> -> vector<2x8x4xf32>
    "tpu.trace_stop"() : () -> ()
    %105 = tpu.reciprocal %102 {approx = true} : vector<2x8x1xf32> -> vector<2x8x1xf32>
    %106 = vector.broadcast %105 : vector<2x8x1xf32> to vector<2x8x4xf32>
    %107 = arith.mulf %104, %106 : vector<2x8x4xf32>
    %108 = vector.extract_strided_slice %12 {offsets = [0, 20], sizes = [16, 4], strides = [1, 1]} : vector<16x96xbf16> to vector<16x4xbf16>
    %109 = vector.shape_cast %108 : vector<16x4xbf16> to vector<2x8x4xbf16>
    %110 = vector.extract_strided_slice %12 {offsets = [0, 52], sizes = [16, 4], strides = [1, 1]} : vector<16x96xbf16> to vector<16x4xbf16>
    %111 = vector.shape_cast %110 : vector<16x4xbf16> to vector<2x8x4xbf16>
    %112 = vector.extract_strided_slice %12 {offsets = [0, 84], sizes = [16, 4], strides = [1, 1]} : vector<16x96xbf16> to vector<16x4xbf16>
    %113 = vector.shape_cast %112 : vector<16x4xbf16> to vector<2x8x4xbf16>
    "tpu.trace_start"() <{level = 10 : i32, message = "bqd,bkd->bqk"}> : () -> ()
    %cst_28 = arith.constant dense<0.000000e+00> : vector<2x8x8xf32>
    %114 = tpu.matmul %109, %111, %cst_28 {dimension_numbers = #tpu.dot_dimension_numbers<[2], [2], [1], [1], [0, 0, 0, 1, 1, 1], [0], [0]>} : vector<2x8x4xbf16>, vector<2x8x4xbf16>, vector<2x8x8xf32> -> vector<2x8x8xf32>
    "tpu.trace_stop"() : () -> ()
    %cst_29 = arith.constant dense<0xFF800000> : vector<2x8xf32>
    %115 = vector.multi_reduction <maximumf>, %114, %cst_29 [2] : vector<2x8x8xf32> to vector<2x8xf32>
    %116 = vector.shape_cast %115 : vector<2x8xf32> to vector<2x8x1xf32>
    %117 = vector.broadcast %116 : vector<2x8x1xf32> to vector<2x8x8xf32>
    %118 = arith.subf %114, %117 : vector<2x8x8xf32>
    %119 = math.exp %118 : vector<2x8x8xf32>
    %cst_30 = arith.constant dense<0.000000e+00> : vector<2x8xf32>
    %120 = vector.multi_reduction <add>, %119, %cst_30 [2] : vector<2x8x8xf32> to vector<2x8xf32>
    %121 = vector.shape_cast %120 : vector<2x8xf32> to vector<2x8x1xf32>
    %122 = arith.truncf %119 : vector<2x8x8xf32> to vector<2x8x8xbf16>
    "tpu.trace_start"() <{level = 10 : i32, message = "bqk,bkd->bqd"}> : () -> ()
    %cst_31 = arith.constant dense<0.000000e+00> : vector<2x8x4xf32>
    %123 = tpu.matmul %122, %113, %cst_31 {dimension_numbers = #tpu.dot_dimension_numbers<[2], [1], [1], [2], [0, 0, 0, 1, 1, 2], [0], [0]>} : vector<2x8x8xbf16>, vector<2x8x4xbf16>, vector<2x8x4xf32> -> vector<2x8x4xf32>
    "tpu.trace_stop"() : () -> ()
    %124 = tpu.reciprocal %121 {approx = true} : vector<2x8x1xf32> -> vector<2x8x1xf32>
    %125 = vector.broadcast %124 : vector<2x8x1xf32> to vector<2x8x4xf32>
    %126 = arith.mulf %123, %125 : vector<2x8x4xf32>
    %127 = vector.extract_strided_slice %12 {offsets = [0, 24], sizes = [16, 4], strides = [1, 1]} : vector<16x96xbf16> to vector<16x4xbf16>
    %128 = vector.shape_cast %127 : vector<16x4xbf16> to vector<2x8x4xbf16>
    %129 = vector.extract_strided_slice %12 {offsets = [0, 56], sizes = [16, 4], strides = [1, 1]} : vector<16x96xbf16> to vector<16x4xbf16>
    %130 = vector.shape_cast %129 : vector<16x4xbf16> to vector<2x8x4xbf16>
    %131 = vector.extract_strided_slice %12 {offsets = [0, 88], sizes = [16, 4], strides = [1, 1]} : vector<16x96xbf16> to vector<16x4xbf16>
    %132 = vector.shape_cast %131 : vector<16x4xbf16> to vector<2x8x4xbf16>
    "tpu.trace_start"() <{level = 10 : i32, message = "bqd,bkd->bqk"}> : () -> ()
    %cst_32 = arith.constant dense<0.000000e+00> : vector<2x8x8xf32>
    %133 = tpu.matmul %128, %130, %cst_32 {dimension_numbers = #tpu.dot_dimension_numbers<[2], [2], [1], [1], [0, 0, 0, 1, 1, 1], [0], [0]>} : vector<2x8x4xbf16>, vector<2x8x4xbf16>, vector<2x8x8xf32> -> vector<2x8x8xf32>
    "tpu.trace_stop"() : () -> ()
    %cst_33 = arith.constant dense<0xFF800000> : vector<2x8xf32>
    %134 = vector.multi_reduction <maximumf>, %133, %cst_33 [2] : vector<2x8x8xf32> to vector<2x8xf32>
    %135 = vector.shape_cast %134 : vector<2x8xf32> to vector<2x8x1xf32>
    %136 = vector.broadcast %135 : vector<2x8x1xf32> to vector<2x8x8xf32>
    %137 = arith.subf %133, %136 : vector<2x8x8xf32>
    %138 = math.exp %137 : vector<2x8x8xf32>
    %cst_34 = arith.constant dense<0.000000e+00> : vector<2x8xf32>
    %139 = vector.multi_reduction <add>, %138, %cst_34 [2] : vector<2x8x8xf32> to vector<2x8xf32>
    %140 = vector.shape_cast %139 : vector<2x8xf32> to vector<2x8x1xf32>
    %141 = arith.truncf %138 : vector<2x8x8xf32> to vector<2x8x8xbf16>
    "tpu.trace_start"() <{level = 10 : i32, message = "bqk,bkd->bqd"}> : () -> ()
    %cst_35 = arith.constant dense<0.000000e+00> : vector<2x8x4xf32>
    %142 = tpu.matmul %141, %132, %cst_35 {dimension_numbers = #tpu.dot_dimension_numbers<[2], [1], [1], [2], [0, 0, 0, 1, 1, 2], [0], [0]>} : vector<2x8x8xbf16>, vector<2x8x4xbf16>, vector<2x8x4xf32> -> vector<2x8x4xf32>
    "tpu.trace_stop"() : () -> ()
    %143 = tpu.reciprocal %140 {approx = true} : vector<2x8x1xf32> -> vector<2x8x1xf32>
    %144 = vector.broadcast %143 : vector<2x8x1xf32> to vector<2x8x4xf32>
    %145 = arith.mulf %142, %144 : vector<2x8x4xf32>
    %146 = vector.extract_strided_slice %12 {offsets = [0, 28], sizes = [16, 4], strides = [1, 1]} : vector<16x96xbf16> to vector<16x4xbf16>
    %147 = vector.shape_cast %146 : vector<16x4xbf16> to vector<2x8x4xbf16>
    %148 = vector.extract_strided_slice %12 {offsets = [0, 60], sizes = [16, 4], strides = [1, 1]} : vector<16x96xbf16> to vector<16x4xbf16>
    %149 = vector.shape_cast %148 : vector<16x4xbf16> to vector<2x8x4xbf16>
    %150 = vector.extract_strided_slice %12 {offsets = [0, 92], sizes = [16, 4], strides = [1, 1]} : vector<16x96xbf16> to vector<16x4xbf16>
    %151 = vector.shape_cast %150 : vector<16x4xbf16> to vector<2x8x4xbf16>
    "tpu.trace_start"() <{level = 10 : i32, message = "bqd,bkd->bqk"}> : () -> ()
    %cst_36 = arith.constant dense<0.000000e+00> : vector<2x8x8xf32>
    %152 = tpu.matmul %147, %149, %cst_36 {dimension_numbers = #tpu.dot_dimension_numbers<[2], [2], [1], [1], [0, 0, 0, 1, 1, 1], [0], [0]>} : vector<2x8x4xbf16>, vector<2x8x4xbf16>, vector<2x8x8xf32> -> vector<2x8x8xf32>
    "tpu.trace_stop"() : () -> ()
    %cst_37 = arith.constant dense<0xFF800000> : vector<2x8xf32>
    %153 = vector.multi_reduction <maximumf>, %152, %cst_37 [2] : vector<2x8x8xf32> to vector<2x8xf32>
    %154 = vector.shape_cast %153 : vector<2x8xf32> to vector<2x8x1xf32>
    %155 = vector.broadcast %154 : vector<2x8x1xf32> to vector<2x8x8xf32>
    %156 = arith.subf %152, %155 : vector<2x8x8xf32>
    %157 = math.exp %156 : vector<2x8x8xf32>
    %cst_38 = arith.constant dense<0.000000e+00> : vector<2x8xf32>
    %158 = vector.multi_reduction <add>, %157, %cst_38 [2] : vector<2x8x8xf32> to vector<2x8xf32>
    %159 = vector.shape_cast %158 : vector<2x8xf32> to vector<2x8x1xf32>
    %160 = arith.truncf %157 : vector<2x8x8xf32> to vector<2x8x8xbf16>
    "tpu.trace_start"() <{level = 10 : i32, message = "bqk,bkd->bqd"}> : () -> ()
    %cst_39 = arith.constant dense<0.000000e+00> : vector<2x8x4xf32>
    %161 = tpu.matmul %160, %151, %cst_39 {dimension_numbers = #tpu.dot_dimension_numbers<[2], [1], [1], [2], [0, 0, 0, 1, 1, 2], [0], [0]>} : vector<2x8x8xbf16>, vector<2x8x4xbf16>, vector<2x8x4xf32> -> vector<2x8x4xf32>
    "tpu.trace_stop"() : () -> ()
    %162 = tpu.reciprocal %159 {approx = true} : vector<2x8x1xf32> -> vector<2x8x1xf32>
    %163 = vector.broadcast %162 : vector<2x8x1xf32> to vector<2x8x4xf32>
    %164 = arith.mulf %161, %163 : vector<2x8x4xf32>
    %165 = tpu.concatenate %31, %50, %69, %88, %107, %126, %145, %164 in 2 : vector<2x8x4xf32>, vector<2x8x4xf32>, vector<2x8x4xf32>, vector<2x8x4xf32>, vector<2x8x4xf32>, vector<2x8x4xf32>, vector<2x8x4xf32>, vector<2x8x4xf32> -> vector<2x8x32xf32>
    %c0_40 = arith.constant 0 : index
    %c0_41 = arith.constant 0 : index
    %c0_42 = arith.constant 0 : index
    %166 = vector.load %arg5[%c0_40, %c0_41, %c0_42] : memref<2x8x32xf32, #tpu.memory_space<vmem>>, vector<2x8x32xf32>
    tpu.vector_store %arg5[%c0_40, %c0_41, %c0_42], %165 {strides = array<i32>} : memref<2x8x32xf32, #tpu.memory_space<vmem>>, vector<2x8x32xf32>,
    return
  }
  func.func @transform_0(%arg0: i32) -> (i32, i32, i32) {
    %c0_i32 = arith.constant 0 : i32
    %c0_i32_0 = arith.constant 0 : i32
    %c0_i32_1 = arith.constant 0 : i32
    return %arg0, %c0_i32, %c0_i32_0 : i32, i32, i32
  }
  func.func @transform_1(%arg0: i32) -> (i32, i32) {
    %c0_i32 = arith.constant 0 : i32
    %c0_i32_0 = arith.constant 0 : i32
    %c0_i32_1 = arith.constant 0 : i32
    return %c0_i32, %c0_i32_0 : i32, i32
  }
  func.func @transform_2(%arg0: i32) -> (i32, i32) {
    %c0_i32 = arith.constant 0 : i32
    %c0_i32_0 = arith.constant 0 : i32
    %c0_i32_1 = arith.constant 0 : i32
    return %c0_i32, %c0_i32_0 : i32, i32
  }
  func.func @transform_3(%arg0: i32) -> (i32, i32) {
    %c0_i32 = arith.constant 0 : i32
    %c0_i32_0 = arith.constant 0 : i32
    %c0_i32_1 = arith.constant 0 : i32
    return %c0_i32, %c0_i32_0 : i32, i32
  }
  func.func @transform_4(%arg0: i32) -> (i32, i32, i32) {
    %c0_i32 = arith.constant 0 : i32
    %c0_i32_0 = arith.constant 0 : i32
    %c0_i32_1 = arith.constant 0 : i32
    return %arg0, %c0_i32, %c0_i32_0 : i32, i32, i32
  }
}

</mosaic_0001>

<bundles_post_ra>
// kernel: tpu_custom_call.1
= control target key start
LH: loop header
LB: loop body
LE: loop exit
PB: predicated region body
PF: predicated region fallthrough
CT: control target
= control target key end

     0   :  { %9 = vsyncpa [#allocation3], 0  ;;  %s2997_s0 = inlined_call_operand.hbm [shape: f32[2,8,32], index: 0, kind: input, shape index: {}]   ;;  %s2998_s1 = inlined_call_operand.hbm [shape: f32[8,32], index: 1, kind: input, shape index: {}]   ;;  %s2999_s2 = inlined_call_operand.hbm [shape: bf16[32,96], index: 2, kind: input, shape index: {}]   ;;  %s3000_s3 = inlined_call_operand.vmem [shape: f32[1,96], index: 3, kind: input, shape index: {}]   ;;  %s3001_s4 = inlined_call_operand.hbm [shape: f32[2,8,32], index: 4, kind: output, shape index: {}]  }
   0x1   :  { %10 = vsyncpa [#allocation6], 0 }
   0x2   :  { %11 = vsyncpa [#allocation4], 0  ;;  %s2496_s15 = smov [#allocation5]   ;;  %s2497_s17 = smov [#allocation2]  }
   0x3   :  { %s30_s16 = sshll.u32 %s2496_s15, 4  ;;  %s17_s18 = sshll.u32 %s2497_s17, 4  ;;  %s31_s16 = int_to_ptr.vmem [resolvable:$true] %s30_s16  ;;  %s2558_s18 = int_to_ptr.vmem [resolvable:$true] %s17_s18 }
   0x4   :  { %s2402_s21 = scalar_lea.hbm %s2998_s1, 128 }
   0x5   :  { %p2403_p0 = scmp.ne.s32.totalorder %s2998_s1, %s2402_s21  ;;  %p2406_p1 = scmp.lt.u32.totalorder %s2402_s21, %s2998_s1 }
   0x7   :  { %p2408_p2 = pnand %p2406_p1, %p2403_p0 }
   0x9   :  { %2411 = shalt.err (!%p2408_p2)
}
   0xa   :  { %s2412_s26 = scalar_lea.vmem %s31_s16, 128  ;;  %p2417_p4 = scmp.lt.s32.totalorder %s31_s16, %s31_s16 }
   0xb   :  { %p2413_p3 = scmp.ne.s32.totalorder %s31_s16, %s2412_s26  ;;  %p2418_p5 = scmp.lt.s32.totalorder %s2412_s26, %s2412_s26 }
   0xd   :  { %p2419_p6 = por %p2418_p5, %p2417_p4 }
   0xf   :  { %p2420_p7 = pnand %p2419_p6, %p2413_p3 }
  0x11   :  { %2423 = shalt.err (!%p2420_p7)
}
  0x12   :  { %33 = dma.hbm_to_vmem [thread:$0]  %s2998_s1, 128, %s31_s16, [#allocation6]  }
  0x13   :  { %s2424_s5 = scalar_lea.hbm %s2997_s0, 256 }
  0x14   :  { %p2425_p8 = scmp.ne.s32.totalorder %s2997_s0, %s2424_s5  ;;  %p2428_p9 = scmp.lt.u32.totalorder %s2424_s5, %s2997_s0 }
  0x16   :  { %p2430_p10 = pnand %p2428_p9, %p2425_p8 }
  0x18   :  { %2433 = shalt.err (!%p2430_p10)
}
  0x19   :  { %s2434_s10 = scalar_lea.vmem %s2558_s18, 256  ;;  %p2439_p12 = scmp.lt.s32.totalorder %s2558_s18, %s2558_s18 }
  0x1a   :  { %p2435_p11 = scmp.ne.s32.totalorder %s2558_s18, %s2434_s10  ;;  %p2440_p13 = scmp.lt.s32.totalorder %s2434_s10, %s2434_s10 }
  0x1c   :  { %p2441_p0 = por %p2440_p13, %p2439_p12 }
  0x1e   :  { %p2442_p1 = pnand %p2441_p0, %p2435_p11 }
  0x20   :  { %2445 = shalt.err (!%p2442_p1)
}
  0x21   :  { %s2498_s1 = smov 128   ;;  %s2499_s11 = smov 8  }
  0x22   :  { %23 = dma.hbm_to_vmem [thread:$0]  %s2997_s0, 256, %s2558_s18, [#allocation3], %s2498_s1, %s2498_s1, %s2499_s11  }
  0x23   :  { %s2500_s14 = smov [#allocation7]   ;;  %s2446_s19 = scalar_lea.hbm %s2999_s2, 256 }
  0x24   :  { %s39_s15 = sshll.u32 %s2500_s14, 4  ;;  %p2447_p2 = scmp.ne.s32.totalorder %s2999_s2, %s2446_s19  ;;  %s40_s15 = int_to_ptr.vmem [resolvable:$true] %s39_s15 }
  0x25   :  { %p2450_p3 = scmp.lt.u32.totalorder %s2446_s19, %s2999_s2 }
  0x27   :  { %p2452_p4 = pnand %p2450_p3, %p2447_p2 }
  0x29   :  { %2455 = shalt.err (!%p2452_p4)
}
  0x2a   :  { %s2456_s24 = scalar_lea.vmem %s40_s15, 256  ;;  %p2461_p6 = scmp.lt.s32.totalorder %s40_s15, %s40_s15 }
  0x2b   :  { %p2457_p5 = scmp.ne.s32.totalorder %s40_s15, %s2456_s24  ;;  %p2462_p7 = scmp.lt.s32.totalorder %s2456_s24, %s2456_s24 }
  0x2d   :  { %p2463_p8 = por %p2462_p7, %p2461_p6 }
  0x2f   :  { %p2464_p9 = pnand %p2463_p8, %p2457_p5 }
  0x31   :  { %2467 = shalt.err (!%p2464_p9)
}
  0x32   :  { %s2501_s0 = smov 64   ;;  %s2502_s18 = smov 4  }
  0x33   :  { %45 = dma.hbm_to_vmem [thread:$0]  %s2999_s2, 256, %s40_s15, [#allocation6], %s2501_s0, %s2501_s0, %s2502_s18  }
  0x34   :  { %2490 = dma.done.wait [#allocation3], 256  }
  0x35   :  { %2491 = vsyncadd [#allocation3], 4294967040 }
  0x36   :  { %2492 = dma.done.wait [#allocation6], 384  }
  0x37   :  { %2493 = vsyncadd [#allocation6], 4294966912  ;;  %v2503_v0 = vmov 0.0   ;;  %vm2504_vm0 = vmmov 0   ;;  %v2336_v1 = vld [vmem:[#allocation7] sm:$0xff]   ;;  %v2337_v2 = vld [vmem:[#allocation7 + $0x8] sm:$0xff]  }
  0x38   :  { %2099 = vmatprep.subr.bf16.mxu0 %v2503_v0  ;;  %2103 = vmatprep.mubr.msk.bf16.mxu0 %vm2504_vm0, %v2503_v0  ;;  %v58_v3 = vld [vmem:[#allocation2] sm:$0xff]  ;;  %v59_v4 = vld [vmem:[#allocation2 + $0x8] sm:$0xff]  ;;  %v60_v5 = vld [vmem:[#allocation5] sm:$0xff]  ;;  %vm87_vm1 = vcmask 261120   ;;  %s2505_s28 = smov 96   ;;  %s2506_s29 = smov 92  }
  0x39   :  { %2107 = vmatprep.subr.bf16.mxu1 %v2503_v0  ;;  %2109 = vmatprep.mubr.msk.bf16.mxu1 %vm2504_vm0, %v2503_v0  ;;  %v61_v6 = vadd.f32 %v60_v5, %v58_v3  ;;  %v62_v7 = vadd.f32 %v60_v5, %v59_v4  ;;  %v1992_v9 = vld [vmem:[%s3000_s3] ss:$0 sm:$0xff]  ;;  %s2507_s3 = smov 124   ;;  %s2508_s30 = smov 60   ;;  %vm140_vm2 = vcmask 31744   ;;  %vm261_vm3 = vcmask 1043456  }
  0x3a   :  { %2100 = vmatpush3.bf16.msra.mxu0 %v2336_v1  ;;  %vm235_vm4 = vcmask 64512   ;;  %s2509_s5 = smov 88   ;;  %s2510_s6 = smov 120   ;;  %vm1957_vm5 = vcmask 97280   ;;  %vm1960_vm6 = vcmask 130048   ;;  %vm1963_vm7 = vcmask 162816  }
  0x3b   :  { %2101 = vmatprep.subr.bf16.mxu0 %v2503_v0  ;;  %v63_v8 = vpack.c.bf16 %v62_v7, %v61_v6  ;;  %s2511_s7 = smov 56   ;;  %s2512_s8 = smov 84   ;;  %vm1969_vm8 = vcmask 228352   ;;  %vm1966_vm9 = vcmask 195584  }
  0x3c   :  { %s2513_s9 = smov 116   ;;  %s2514_s10 = smov 52  }
  0x3d   :  { %s2515_s12 = smov 80   ;;  %s2516_s13 = smov 112  }
  0x3e   :  { %2102 = vmatpush3.bf16.msra.mxu0 %v2337_v2  ;;  %s2517_s14 = smov 48   ;;  %s2518_s15 = smov 76  }
  0x3f   :  { %2113 = vmatprep.subr.bf16.mxu0 %v2503_v0  ;;  %s2519_s16 = smov 108   ;;  %s2520_s17 = smov 44  }
  0x40   :  { %s2521_s19 = smov 72   ;;  %s2522_s20 = smov 104  }
  0x41   :  { %2104 = vmatmul.mubr.msk.bf16.vlgmr.msra.gmra.mrb[0].mxu0 %vm87_vm1, %v63_v8  ;;  %s2523_s21 = smov 40   ;;  %s2524_s22 = smov 68  }
  0x42   :  { %2115 = vmatprep.mubr.msk.bf16.mxu0 %vm2504_vm0, %v2503_v0  ;;  %s2525_s23 = smov 100   ;;  %s2526_s24 = smov 36  }
  0x43   :  { %s2529_s25 = smov 20   ;;  %s2530_s26 = smov 24  }
  0x44   :  { %s2531_s2 = smov 28   ;;  %s2532_s27 = smov [#allocation8]  }
 0x114   :  { %v125_v10 = vpop.f32.mrb[0].mxu0 }
 0x115   :  { %v126_v11 = vadd.f32 %v1992_v9, %v125_v10  ;;  %v2105_v12 = vpop.f32.mrb[1].mxu0 }
 0x116   :  { %v128_v13 = vpop.f32.mrb[2].mxu0 }
 0x117   :  { %v2621_v14 = vpack.c.bf16 %v126_v11, %v126_v11  ;;  %v129_v15 = vadd.f32 %v1992_v9, %v128_v13  ;;  %v2106_v16 = vpop.f32.mrb[3].mxu0 }
 0x119   :  { %138 = vrot.lane.b32.xlu0 %v2621_v14, %s2505_s28  ;;  %v2624_v17 = vpack.c.bf16 %v129_v15, %v129_v15 }
 0x11d   :  { %187 = vrot.lane.b32.xlu0 %v2624_v17, %s2505_s28  ;;  %s1979_s28 = sshll.u32 %s2532_s27, 4  ;;  %s1980_s28 = int_to_ptr.vmem [resolvable:$true] %s1979_s28 }
 0x11e   :  { %p2473_p11 = scmp.lt.s32.totalorder %s1980_s28, %s1980_s28 }
 0x121   :  { %256 = vrot.lane.b32.xlu0 %v2621_v14, %s2501_s0 }
 0x125   :  { %359 = vrot.lane.b32.xlu0 %v2621_v14, %s2506_s29 }
 0x129   :  { %409 = vrot.lane.b32.xlu0 %v2624_v17, %s2506_s29  ;;  %s2468_s29 = scalar_lea.vmem %s1980_s28, 256 }
 0x12a   :  { %p2469_p10 = scmp.ne.s32.totalorder %s1980_s28, %s2468_s29  ;;  %p2474_p12 = scmp.lt.s32.totalorder %s2468_s29, %s2468_s29 }
 0x12c   :  { %p2475_p13 = por %p2474_p12, %p2473_p11 }
 0x12d   :  { %357 = vrot.lane.b32.xlu0 %v2621_v14, %s2507_s3 }
 0x12e   :  { %p2476_p0 = pnand %p2475_p13, %p2469_p10 }
 0x131   :  { %407 = vrot.lane.b32.xlu0 %v2624_v17, %s2507_s3 }
 0x135   :  { %477 = vrot.lane.b32.xlu0 %v2621_v14, %s2508_s30 }
 0x18b   :  { %v139_v18 = vpop.permute.xlu0 %138 }
 0x18c   :  { %v145_v19 = vsel %vm140_vm2, %v139_v18, 0 }
 0x18d   :  { %2108 = vmatpush3.bf16.xpose.msra.mxu1 %v145_v19 }
 0x18e   :  { %2119 = vmatprep.subr.bf16.mxu1 %v2503_v0 }
 0x18f   :  { %v188_v20 = vpop.permute.xlu0 %187 }
 0x190   :  { %v193_v21 = vsel %vm140_vm2, %v188_v20, 0 }
 0x191   :  { %2114 = vmatpush3.bf16.xpose.msra.mxu0 %v193_v21 }
 0x192   :  { %2125 = vmatprep.subr.bf16.mxu0 %v2503_v0 }
 0x193   :  { %v257_v22 = vpop.permute.xlu0 %256 }
 0x194   :  { %v263_v23 = vsel %vm261_vm3, %v257_v22, 0  ;;  %2110 = vmatmul.mubr.msk.bf16.vlgmr.msra.gmra.mrb[0].mxu1 %vm140_vm2, %v2621_v14 }
 0x195   :  { %2120 = vmatpush3.bf16.msra.mxu1 %v263_v23  ;;  %2121 = vmatprep.mubr.msk.bf16.mxu1 %vm2504_vm0, %v2503_v0 }
 0x196   :  { %2131 = vmatprep.subr.bf16.mxu1 %v2503_v0 }
 0x197   :  { %v360_v34 = vpop.permute.xlu0 %359 }
 0x198   :  { %2116 = vmatmul.mubr.msk.bf16.vlgmr.msra.gmra.mrb[4].mxu0 %vm140_vm2, %v2624_v17  ;;  %v365_v48 = vsel %vm140_vm2, %v360_v34, 0 }
 0x199   :  { %2127 = vmatprep.mubr.msk.bf16.mxu0 %vm2504_vm0, %v2503_v0 }
 0x19b   :  { %v410_v39 = vpop.permute.xlu0 %409 }
 0x19c   :  { %v415_v51 = vsel %vm140_vm2, %v410_v39, 0 }
 0x19f   :  { %v358_v44 = vpop.permute.xlu0 %357 }
 0x1a3   :  { %v408_v47 = vpop.permute.xlu0 %407 }
 0x1a7   :  { %v478_v52 = vpop.permute.xlu0 %477 }
 0x1a8   :  { %v483_v53 = vsel %vm261_vm3, %v478_v52, 0 }
 0x267   :  { %v181_v24 = vpop.f32.mrb[0].mxu1 }
 0x268   :  { %v2111_v25 = vpop.f32.mrb[1].mxu1  ;;  %v236_v26 = vsel %vm235_vm4, %v181_v24, -inf }
 0x269   :  { %237 = vmax.xlane.f32.xlu1 %v236_v26  ;;  %v184_v27 = vpop.f32.mrb[2].mxu1 }
 0x26a   :  { %v2112_v28 = vpop.f32.mrb[3].mxu1 }
 0x26b   :  { %v229_v29 = vpop.f32.mrb[4].mxu0 }
 0x26c   :  { %v2117_v30 = vpop.f32.mrb[5].mxu0  ;;  %v239_v31 = vsel %vm235_vm4, %v229_v29, -inf }
 0x26d   :  { %240 = vmax.xlane.f32.xlu1 %v239_v31  ;;  %v232_v32 = vpop.f32.mrb[6].mxu0 }
 0x26e   :  { %v2118_v33 = vpop.f32.mrb[7].mxu0 }
 0x27e   :  { %305 = vrot.lane.b32.xlu1 %v2624_v17, %s2501_s0  ;;  %s2527_s0 = smov 12  }
 0x282   :  { %525 = vrot.lane.b32.xlu1 %v2624_v17, %s2508_s30 }
 0x2f6   :  { %v238_v35 = vpop.xlane.xlu1 %237 }
 0x2f7   :  { %v242_v36 = vsub.f32 %v181_v24, %v238_v35 }
 0x2f9   :  { %v244_v37 = vmul.f32 1.442695, %v242_v36 }
 0x2fa   :  { %v241_v38 = vpop.xlane.xlu1 %240 }
 0x2fb   :  { %2338 = vpow2.f32 %v244_v37  ;;  %v243_v40 = vsub.f32 %v229_v29, %v241_v38 }
 0x2fd   :  { %v246_v41 = vmul.f32 1.442695, %v243_v40 }
 0x2fe   :  { %v306_v42 = vpop.permute.xlu1 %305 }
 0x2ff   :  { %2340 = vpow2.f32 %v246_v41  ;;  %v311_v43 = vsel %vm261_vm3, %v306_v42, 0 }
 0x300   :  { %2126 = vmatpush3.bf16.msra.mxu0 %v311_v43 }
 0x301   :  { %2137 = vmatprep.subr.bf16.mxu0 %v2503_v0 }
 0x302   :  { %v526_v54 = vpop.permute.xlu1 %525 }
 0x303   :  { %v531_v55 = vsel %vm261_vm3, %v526_v54, 0 }
 0x305   :  { %v2657_v45 = vpop.eup %2338 }
 0x306   :  { %v254_v46 = vpack.c.bf16 %v2657_v45, %v2657_v45 }
 0x308   :  { %2122 = vmatmul.mubr.msk.bf16.vlgmr.msra.gmra.mrb[4].mxu1 %vm235_vm4, %v254_v46 }
 0x309   :  { %v2663_v49 = vpop.eup %2340  ;;  %2132 = vmatpush3.bf16.xpose.msra.mxu1 %v365_v48  ;;  %2133 = vmatprep.mubr.msk.bf16.mxu1 %vm2504_vm0, %v2503_v0 }
 0x30a   :  { %v255_v50 = vpack.c.bf16 %v2663_v49, %v2663_v49  ;;  %2143 = vmatprep.subr.bf16.mxu1 %v2503_v0 }
 0x30c   :  { %2128 = vmatmul.mubr.msk.bf16.vlgmr.msra.gmra.mrb[8].mxu0 %vm235_vm4, %v255_v50 }
 0x30d   :  { %2138 = vmatpush3.bf16.xpose.msra.mxu0 %v415_v51  ;;  %2139 = vmatprep.mubr.msk.bf16.mxu0 %vm2504_vm0, %v2503_v0 }
 0x30e   :  { %2149 = vmatprep.subr.bf16.mxu0 %v2503_v0 }
 0x310   :  { %2134 = vmatmul.mubr.msk.bf16.vlgmr.msra.gmra.mrb[8].mxu1 %vm140_vm2, %v358_v44 }
 0x311   :  { %2144 = vmatpush3.bf16.msra.mxu1 %v483_v53  ;;  %2145 = vmatprep.mubr.msk.bf16.mxu1 %vm2504_vm0, %v2503_v0 }
 0x312   :  { %2155 = vmatprep.subr.bf16.mxu1 %v2503_v0 }
 0x314   :  { %2140 = vmatmul.mubr.msk.bf16.vlgmr.msra.gmra.mrb[12].mxu0 %vm140_vm2, %v408_v47 }
 0x315   :  { %2150 = vmatpush3.bf16.msra.mxu0 %v531_v55  ;;  %2151 = vmatprep.mubr.msk.bf16.mxu0 %vm2504_vm0, %v2503_v0 }
 0x316   :  { %2161 = vmatprep.subr.bf16.mxu0 %v2503_v0 }
 0x3db   :  { %v2685_v56 = vpop.f32.mrb[4].mxu1 }
 0x3dc   :  { %v2123_v57 = vpop.f32.mrb[5].mxu1 }
 0x3dd   :  { %v302_v58 = vpop.f32.mrb[6].mxu1 }
 0x3de   :  { %v2124_v59 = vpop.f32.mrb[7].mxu1 }
 0x3df   :  { %v2687_v60 = vpop.f32.mrb[8].mxu0 }
 0x3e0   :  { %v2129_v61 = vpop.f32.mrb[9].mxu0 }
 0x3e1   :  { %v350_v62 = vpop.f32.mrb[10].mxu0 }
 0x3e2   :  { %v2130_v63 = vpop.f32.mrb[11].mxu0 }
 0x3e3   :  { %v401_v1 = vpop.f32.mrb[8].mxu1 }
 0x3e4   :  { %v2135_v2 = vpop.f32.mrb[9].mxu1  ;;  %v457_v3 = vsel %vm235_vm4, %v401_v1, -inf }
 0x3e5   :  { %v404_v4 = vpop.f32.mrb[10].mxu1  ;;  %458 = vmax.xlane.f32.xlu1 %v457_v3 }
 0x3e6   :  { %v2136_v5 = vpop.f32.mrb[11].mxu1 }
 0x3e7   :  { %v451_v6 = vpop.f32.mrb[12].mxu0 }
 0x3e8   :  { %v2141_v7 = vpop.f32.mrb[13].mxu0  ;;  %v460_v8 = vsel %vm235_vm4, %v451_v6, -inf }
 0x3e9   :  { %461 = vmax.xlane.f32.xlu0 %v460_v8  ;;  %v454_v9 = vpop.f32.mrb[14].mxu0 }
 0x3ea   :  { %v2142_v10 = vpop.f32.mrb[15].mxu0 }
 0x3f6   :  { %579 = vrot.lane.b32.xlu1 %v2621_v14, %s2509_s5 }
 0x3fa   :  { %577 = vrot.lane.b32.xlu1 %v2621_v14, %s2510_s6 }
 0x3fe   :  { %745 = vrot.lane.b32.xlu1 %v2624_v17, %s2511_s7 }
 0x3ff   :  { %629 = vrot.lane.b32.xlu0 %v2624_v17, %s2509_s5 }
 0x403   :  { %627 = vrot.lane.b32.xlu0 %v2624_v17, %s2510_s6 }
 0x407   :  { %697 = vrot.lane.b32.xlu0 %v2621_v14, %s2511_s7 }
 0x472   :  { %v459_v11 = vpop.xlane.xlu1 %458 }
 0x473   :  { %v463_v12 = vsub.f32 %v401_v1, %v459_v11 }
 0x475   :  { %v465_v13 = vmul.f32 1.442695, %v463_v12 }
 0x476   :  { %v462_v15 = vpop.xlane.xlu0 %461  ;;  %v580_v21 = vpop.permute.xlu1 %579 }
 0x477   :  { %2342 = vpow2.f32 %v465_v13  ;;  %v464_v16 = vsub.f32 %v451_v6, %v462_v15  ;;  %v585_v24 = vsel %vm140_vm2, %v580_v21, 0 }
 0x479   :  { %v467_v18 = vmul.f32 1.442695, %v464_v16 }
 0x47a   :  { %v630_v19 = vpop.permute.xlu0 %629  ;;  %v578_v27 = vpop.permute.xlu1 %577 }
 0x47b   :  { %2344 = vpow2.f32 %v467_v18  ;;  %v635_v28 = vsel %vm140_vm2, %v630_v19, 0 }
 0x47e   :  { %v628_v23 = vpop.permute.xlu0 %627  ;;  %v746_v31 = vpop.permute.xlu1 %745 }
 0x47f   :  { %v751_v32 = vsel %vm261_vm3, %v746_v31, 0 }
 0x481   :  { %v2697_v20 = vpop.eup %2342 }
 0x482   :  { %v475_v22 = vpack.c.bf16 %v2697_v20, %v2697_v20  ;;  %v698_v29 = vpop.permute.xlu0 %697 }
 0x483   :  { %v703_v30 = vsel %vm261_vm3, %v698_v29, 0 }
 0x484   :  { %2146 = vmatmul.mubr.msk.bf16.vlgmr.msra.gmra.mrb[12].mxu1 %vm235_vm4, %v475_v22 }
 0x485   :  { %v2703_v25 = vpop.eup %2344  ;;  %2156 = vmatpush3.bf16.xpose.msra.mxu1 %v585_v24  ;;  %2157 = vmatprep.mubr.msk.bf16.mxu1 %vm2504_vm0, %v2503_v0 }
 0x486   :  { %v476_v26 = vpack.c.bf16 %v2703_v25, %v2703_v25  ;;  %2167 = vmatprep.subr.bf16.mxu1 %v2503_v0 }
 0x488   :  { %2152 = vmatmul.mubr.msk.bf16.vlgmr.msra.gmra.mrb[16].mxu0 %vm235_vm4, %v476_v26 }
 0x489   :  { %2162 = vmatpush3.bf16.xpose.msra.mxu0 %v635_v28  ;;  %2163 = vmatprep.mubr.msk.bf16.mxu0 %vm2504_vm0, %v2503_v0 }
 0x48a   :  { %2173 = vmatprep.subr.bf16.mxu0 %v2503_v0 }
 0x48c   :  { %2158 = vmatmul.mubr.msk.bf16.vlgmr.msra.gmra.mrb[16].mxu1 %vm140_vm2, %v578_v27 }
 0x48d   :  { %2168 = vmatpush3.bf16.msra.mxu1 %v703_v30  ;;  %2169 = vmatprep.mubr.msk.bf16.mxu1 %vm2504_vm0, %v2503_v0 }
 0x48e   :  { %2179 = vmatprep.subr.bf16.mxu1 %v2503_v0 }
 0x490   :  { %2164 = vmatmul.mubr.msk.bf16.vlgmr.msra.gmra.mrb[20].mxu0 %vm140_vm2, %v628_v23 }
 0x491   :  { %2174 = vmatpush3.bf16.msra.mxu0 %v751_v32  ;;  %2175 = vmatprep.mubr.msk.bf16.mxu0 %vm2504_vm0, %v2503_v0 }
 0x492   :  { %2185 = vmatprep.subr.bf16.mxu0 %v2503_v0 }
 0x557   :  { %v2725_v33 = vpop.f32.mrb[12].mxu1 }
 0x558   :  { %v2147_v34 = vpop.f32.mrb[13].mxu1 }
 0x559   :  { %v522_v35 = vpop.f32.mrb[14].mxu1 }
 0x55a   :  { %v2148_v36 = vpop.f32.mrb[15].mxu1 }
 0x55b   :  { %v2727_v37 = vpop.f32.mrb[16].mxu0 }
 0x55c   :  { %v2153_v38 = vpop.f32.mrb[17].mxu0 }
 0x55d   :  { %v570_v39 = vpop.f32.mrb[18].mxu0 }
 0x55e   :  { %v2154_v40 = vpop.f32.mrb[19].mxu0 }
 0x55f   :  { %v621_v41 = vpop.f32.mrb[16].mxu1 }
 0x560   :  { %v2159_v42 = vpop.f32.mrb[17].mxu1  ;;  %v677_v43 = vsel %vm235_vm4, %v621_v41, -inf }
 0x561   :  { %678 = vmax.xlane.f32.xlu1 %v677_v43  ;;  %v624_v44 = vpop.f32.mrb[18].mxu1 }
 0x562   :  { %v2160_v46 = vpop.f32.mrb[19].mxu1 }
 0x563   :  { %v671_v47 = vpop.f32.mrb[20].mxu0 }
 0x564   :  { %v2165_v48 = vpop.f32.mrb[21].mxu0  ;;  %v680_v50 = vsel %vm235_vm4, %v671_v47, -inf }
 0x565   :  { %681 = vmax.xlane.f32.xlu0 %v680_v50  ;;  %v674_v51 = vpop.f32.mrb[22].mxu0 }
 0x566   :  { %v2166_v52 = vpop.f32.mrb[23].mxu0 }
 0x572   :  { %799 = vrot.lane.b32.xlu1 %v2621_v14, %s2512_s8 }
 0x576   :  { %797 = vrot.lane.b32.xlu1 %v2621_v14, %s2513_s9 }
 0x57a   :  { %965 = vrot.lane.b32.xlu1 %v2624_v17, %s2514_s10 }
 0x57b   :  { %849 = vrot.lane.b32.xlu0 %v2624_v17, %s2512_s8 }
 0x57f   :  { %847 = vrot.lane.b32.xlu0 %v2624_v17, %s2513_s9 }
 0x583   :  { %917 = vrot.lane.b32.xlu0 %v2621_v14, %s2514_s10 }
 0x5ee   :  { %v679_v53 = vpop.xlane.xlu1 %678 }
 0x5ef   :  { %v683_v54 = vsub.f32 %v621_v41, %v679_v53 }
 0x5f1   :  { %v685_v55 = vmul.f32 1.442695, %v683_v54 }
 0x5f2   :  { %v682_v57 = vpop.xlane.xlu0 %681  ;;  %v800_v63 = vpop.permute.xlu1 %799 }
 0x5f3   :  { %2346 = vpow2.f32 %v685_v55  ;;  %v684_v58 = vsub.f32 %v671_v47, %v682_v57  ;;  %v805_v3 = vsel %vm140_vm2, %v800_v63, 0 }
 0x5f5   :  { %v687_v59 = vmul.f32 1.442695, %v684_v58 }
 0x5f6   :  { %v850_v61 = vpop.permute.xlu0 %849  ;;  %v798_v6 = vpop.permute.xlu1 %797 }
 0x5f7   :  { %2348 = vpow2.f32 %v687_v59  ;;  %v855_v7 = vsel %vm140_vm2, %v850_v61, 0 }
 0x5fa   :  { %v848_v2 = vpop.permute.xlu0 %847  ;;  %v966_v10 = vpop.permute.xlu1 %965 }
 0x5fb   :  { %v971_v11 = vsel %vm261_vm3, %v966_v10, 0 }
 0x5fd   :  { %v2737_v62 = vpop.eup %2346 }
 0x5fe   :  { %v695_v1 = vpack.c.bf16 %v2737_v62, %v2737_v62  ;;  %v918_v8 = vpop.permute.xlu0 %917 }
 0x5ff   :  { %v923_v9 = vsel %vm261_vm3, %v918_v8, 0 }
 0x600   :  { %2170 = vmatmul.mubr.msk.bf16.vlgmr.msra.gmra.mrb[20].mxu1 %vm235_vm4, %v695_v1 }
 0x601   :  { %v2743_v4 = vpop.eup %2348  ;;  %2180 = vmatpush3.bf16.xpose.msra.mxu1 %v805_v3  ;;  %2181 = vmatprep.mubr.msk.bf16.mxu1 %vm2504_vm0, %v2503_v0 }
 0x602   :  { %v696_v5 = vpack.c.bf16 %v2743_v4, %v2743_v4  ;;  %2191 = vmatprep.subr.bf16.mxu1 %v2503_v0 }
 0x604   :  { %2176 = vmatmul.mubr.msk.bf16.vlgmr.msra.gmra.mrb[24].mxu0 %vm235_vm4, %v696_v5 }
 0x605   :  { %2186 = vmatpush3.bf16.xpose.msra.mxu0 %v855_v7  ;;  %2187 = vmatprep.mubr.msk.bf16.mxu0 %vm2504_vm0, %v2503_v0 }
 0x606   :  { %2197 = vmatprep.subr.bf16.mxu0 %v2503_v0 }
 0x608   :  { %2182 = vmatmul.mubr.msk.bf16.vlgmr.msra.gmra.mrb[24].mxu1 %vm140_vm2, %v798_v6 }
 0x609   :  { %2192 = vmatpush3.bf16.msra.mxu1 %v923_v9  ;;  %2193 = vmatprep.mubr.msk.bf16.mxu1 %vm2504_vm0, %v2503_v0 }
 0x60a   :  { %2203 = vmatprep.subr.bf16.mxu1 %v2503_v0 }
 0x60c   :  { %2188 = vmatmul.mubr.msk.bf16.vlgmr.msra.gmra.mrb[28].mxu0 %vm140_vm2, %v848_v2 }
 0x60d   :  { %2198 = vmatpush3.bf16.msra.mxu0 %v971_v11  ;;  %2199 = vmatprep.mubr.msk.bf16.mxu0 %vm2504_vm0, %v2503_v0 }
 0x60e   :  { %2209 = vmatprep.subr.bf16.mxu0 %v2503_v0 }
 0x6d3   :  { %v2765_v12 = vpop.f32.mrb[20].mxu1 }
 0x6d4   :  { %v2171_v13 = vpop.f32.mrb[21].mxu1 }
 0x6d5   :  { %v742_v15 = vpop.f32.mrb[22].mxu1 }
 0x6d6   :  { %v2172_v16 = vpop.f32.mrb[23].mxu1 }
 0x6d7   :  { %v2767_v18 = vpop.f32.mrb[24].mxu0 }
 0x6d8   :  { %v2177_v19 = vpop.f32.mrb[25].mxu0 }
 0x6d9   :  { %v790_v21 = vpop.f32.mrb[26].mxu0 }
 0x6da   :  { %v2178_v22 = vpop.f32.mrb[27].mxu0 }
 0x6db   :  { %v841_v23 = vpop.f32.mrb[24].mxu1 }
 0x6dc   :  { %v2183_v24 = vpop.f32.mrb[25].mxu1  ;;  %v897_v26 = vsel %vm235_vm4, %v841_v23, -inf }
 0x6dd   :  { %898 = vmax.xlane.f32.xlu1 %v897_v26  ;;  %v844_v27 = vpop.f32.mrb[26].mxu1 }
 0x6de   :  { %v2184_v28 = vpop.f32.mrb[27].mxu1 }
 0x6df   :  { %v891_v29 = vpop.f32.mrb[28].mxu0 }
 0x6e0   :  { %v2189_v30 = vpop.f32.mrb[29].mxu0  ;;  %v900_v31 = vsel %vm235_vm4, %v891_v29, -inf }
 0x6e1   :  { %901 = vmax.xlane.f32.xlu0 %v900_v31  ;;  %v894_v32 = vpop.f32.mrb[30].mxu0 }
 0x6e2   :  { %v2190_v34 = vpop.f32.mrb[31].mxu0 }
 0x6ee   :  { %1019 = vrot.lane.b32.xlu1 %v2621_v14, %s2515_s12 }
 0x6f2   :  { %1017 = vrot.lane.b32.xlu1 %v2621_v14, %s2516_s13 }
 0x6f6   :  { %1185 = vrot.lane.b32.xlu1 %v2624_v17, %s2517_s14 }
 0x6f7   :  { %1069 = vrot.lane.b32.xlu0 %v2624_v17, %s2515_s12 }
 0x6fb   :  { %1067 = vrot.lane.b32.xlu0 %v2624_v17, %s2516_s13 }
 0x6ff   :  { %1137 = vrot.lane.b32.xlu0 %v2621_v14, %s2517_s14 }
 0x76a   :  { %v899_v35 = vpop.xlane.xlu1 %898 }
 0x76b   :  { %v903_v36 = vsub.f32 %v841_v23, %v899_v35 }
 0x76d   :  { %v905_v38 = vmul.f32 1.442695, %v903_v36 }
 0x76e   :  { %v902_v39 = vpop.xlane.xlu0 %901  ;;  %v1020_v44 = vpop.permute.xlu1 %1019 }
 0x76f   :  { %2350 = vpow2.f32 %v905_v38  ;;  %v904_v40 = vsub.f32 %v891_v29, %v902_v39  ;;  %v1025_v48 = vsel %vm140_vm2, %v1020_v44, 0 }
 0x771   :  { %v907_v41 = vmul.f32 1.442695, %v904_v40 }
 0x772   :  { %v1070_v42 = vpop.permute.xlu0 %1069  ;;  %v1018_v52 = vpop.permute.xlu1 %1017 }
 0x773   :  { %2352 = vpow2.f32 %v907_v41  ;;  %v1075_v53 = vsel %vm140_vm2, %v1070_v42, 0 }
 0x776   :  { %v1068_v47 = vpop.permute.xlu0 %1067  ;;  %v1186_v57 = vpop.permute.xlu1 %1185 }
 0x777   :  { %v1191_v58 = vsel %vm261_vm3, %v1186_v57, 0 }
 0x779   :  { %v2777_v43 = vpop.eup %2350 }
 0x77a   :  { %v915_v46 = vpack.c.bf16 %v2777_v43, %v2777_v43  ;;  %v1138_v54 = vpop.permute.xlu0 %1137 }
 0x77b   :  { %v1143_v55 = vsel %vm261_vm3, %v1138_v54, 0 }
 0x77c   :  { %2194 = vmatmul.mubr.msk.bf16.vlgmr.msra.gmra.mrb[28].mxu1 %vm235_vm4, %v915_v46 }
 0x77d   :  { %v2783_v50 = vpop.eup %2352  ;;  %2204 = vmatpush3.bf16.xpose.msra.mxu1 %v1025_v48  ;;  %2205 = vmatprep.mubr.msk.bf16.mxu1 %vm2504_vm0, %v2503_v0 }
 0x77e   :  { %v916_v51 = vpack.c.bf16 %v2783_v50, %v2783_v50  ;;  %2215 = vmatprep.subr.bf16.mxu1 %v2503_v0 }
 0x780   :  { %2200 = vmatmul.mubr.msk.bf16.vlgmr.msra.gmra.mrb[32].mxu0 %vm235_vm4, %v916_v51 }
 0x781   :  { %2210 = vmatpush3.bf16.xpose.msra.mxu0 %v1075_v53  ;;  %2211 = vmatprep.mubr.msk.bf16.mxu0 %vm2504_vm0, %v2503_v0 }
 0x782   :  { %2221 = vmatprep.subr.bf16.mxu0 %v2503_v0 }
 0x784   :  { %2206 = vmatmul.mubr.msk.bf16.vlgmr.msra.gmra.mrb[32].mxu1 %vm140_vm2, %v1018_v52 }
 0x785   :  { %2216 = vmatpush3.bf16.msra.mxu1 %v1143_v55  ;;  %2217 = vmatprep.mubr.msk.bf16.mxu1 %vm2504_vm0, %v2503_v0 }
 0x786   :  { %2227 = vmatprep.subr.bf16.mxu1 %v2503_v0 }
 0x788   :  { %2212 = vmatmul.mubr.msk.bf16.vlgmr.msra.gmra.mrb[36].mxu0 %vm140_vm2, %v1068_v47 }
 0x789   :  { %2222 = vmatpush3.bf16.msra.mxu0 %v1191_v58  ;;  %2223 = vmatprep.mubr.msk.bf16.mxu0 %vm2504_vm0, %v2503_v0 }
 0x78a   :  { %2233 = vmatprep.subr.bf16.mxu0 %v2503_v0 }
 0x84f   :  { %v2805_v59 = vpop.f32.mrb[28].mxu1 }
 0x850   :  { %v2195_v61 = vpop.f32.mrb[29].mxu1 }
 0x851   :  { %v962_v63 = vpop.f32.mrb[30].mxu1 }
 0x852   :  { %v2196_v1 = vpop.f32.mrb[31].mxu1 }
 0x853   :  { %v2807_v2 = vpop.f32.mrb[32].mxu0 }
 0x854   :  { %v2201_v3 = vpop.f32.mrb[33].mxu0 }
 0x855   :  { %v1010_v5 = vpop.f32.mrb[34].mxu0 }
 0x856   :  { %v2202_v6 = vpop.f32.mrb[35].mxu0 }
 0x857   :  { %v1061_v7 = vpop.f32.mrb[32].mxu1 }
 0x858   :  { %v2207_v8 = vpop.f32.mrb[33].mxu1  ;;  %v1117_v9 = vsel %vm235_vm4, %v1061_v7, -inf }
 0x859   :  { %1118 = vmax.xlane.f32.xlu1 %v1117_v9  ;;  %v1064_v10 = vpop.f32.mrb[34].mxu1 }
 0x85a   :  { %v2208_v11 = vpop.f32.mrb[35].mxu1 }
 0x85b   :  { %v1111_v13 = vpop.f32.mrb[36].mxu0 }
 0x85c   :  { %v2213_v15 = vpop.f32.mrb[37].mxu0  ;;  %v1120_v16 = vsel %vm235_vm4, %v1111_v13, -inf }
 0x85d   :  { %1121 = vmax.xlane.f32.xlu0 %v1120_v16  ;;  %v1114_v19 = vpop.f32.mrb[38].mxu0 }
 0x85e   :  { %v2214_v21 = vpop.f32.mrb[39].mxu0 }
 0x86a   :  { %1239 = vrot.lane.b32.xlu1 %v2621_v14, %s2518_s15 }
 0x86e   :  { %1237 = vrot.lane.b32.xlu1 %v2621_v14, %s2519_s16 }
 0x872   :  { %1405 = vrot.lane.b32.xlu1 %v2624_v17, %s2520_s17 }
 0x873   :  { %1289 = vrot.lane.b32.xlu0 %v2624_v17, %s2518_s15 }
 0x877   :  { %1287 = vrot.lane.b32.xlu0 %v2624_v17, %s2519_s16 }
 0x87b   :  { %1357 = vrot.lane.b32.xlu0 %v2621_v14, %s2520_s17 }
 0x8e6   :  { %v1119_v22 = vpop.xlane.xlu1 %1118 }
 0x8e7   :  { %v1123_v23 = vsub.f32 %v1061_v7, %v1119_v22 }
 0x8e9   :  { %v1125_v24 = vmul.f32 1.442695, %v1123_v23 }
 0x8ea   :  { %v1122_v26 = vpop.xlane.xlu0 %1121  ;;  %v1240_v31 = vpop.permute.xlu1 %1239 }
 0x8eb   :  { %2354 = vpow2.f32 %v1125_v24  ;;  %v1124_v27 = vsub.f32 %v1111_v13, %v1122_v26  ;;  %v1245_v35 = vsel %vm140_vm2, %v1240_v31, 0 }
 0x8ed   :  { %v1127_v28 = vmul.f32 1.442695, %v1124_v27 }
 0x8ee   :  { %v1290_v29 = vpop.permute.xlu0 %1289  ;;  %v1238_v39 = vpop.permute.xlu1 %1237 }
 0x8ef   :  { %2356 = vpow2.f32 %v1127_v28  ;;  %v1295_v40 = vsel %vm140_vm2, %v1290_v29, 0 }
 0x8f2   :  { %v1288_v34 = vpop.permute.xlu0 %1287  ;;  %v1406_v44 = vpop.permute.xlu1 %1405 }
 0x8f3   :  { %v1411_v46 = vsel %vm261_vm3, %v1406_v44, 0 }
 0x8f5   :  { %v2817_v30 = vpop.eup %2354 }
 0x8f6   :  { %v1135_v32 = vpack.c.bf16 %v2817_v30, %v2817_v30  ;;  %v1358_v41 = vpop.permute.xlu0 %1357 }
 0x8f7   :  { %v1363_v42 = vsel %vm261_vm3, %v1358_v41, 0 }
 0x8f8   :  { %2218 = vmatmul.mubr.msk.bf16.vlgmr.msra.gmra.mrb[36].mxu1 %vm235_vm4, %v1135_v32 }
 0x8f9   :  { %v2823_v36 = vpop.eup %2356  ;;  %2228 = vmatpush3.bf16.xpose.msra.mxu1 %v1245_v35  ;;  %2229 = vmatprep.mubr.msk.bf16.mxu1 %vm2504_vm0, %v2503_v0 }
 0x8fa   :  { %v1136_v38 = vpack.c.bf16 %v2823_v36, %v2823_v36  ;;  %2239 = vmatprep.subr.bf16.mxu1 %v2503_v0 }
 0x8fc   :  { %2224 = vmatmul.mubr.msk.bf16.vlgmr.msra.gmra.mrb[40].mxu0 %vm235_vm4, %v1136_v38 }
 0x8fd   :  { %2234 = vmatpush3.bf16.xpose.msra.mxu0 %v1295_v40  ;;  %2235 = vmatprep.mubr.msk.bf16.mxu0 %vm2504_vm0, %v2503_v0 }
 0x8fe   :  { %2245 = vmatprep.subr.bf16.mxu0 %v2503_v0 }
 0x900   :  { %2230 = vmatmul.mubr.msk.bf16.vlgmr.msra.gmra.mrb[40].mxu1 %vm140_vm2, %v1238_v39 }
 0x901   :  { %2240 = vmatpush3.bf16.msra.mxu1 %v1363_v42  ;;  %2241 = vmatprep.mubr.msk.bf16.mxu1 %vm2504_vm0, %v2503_v0 }
 0x902   :  { %2251 = vmatprep.subr.bf16.mxu1 %v2503_v0 }
 0x904   :  { %2236 = vmatmul.mubr.msk.bf16.vlgmr.msra.gmra.mrb[44].mxu0 %vm140_vm2, %v1288_v34 }
 0x905   :  { %2246 = vmatpush3.bf16.msra.mxu0 %v1411_v46  ;;  %2247 = vmatprep.mubr.msk.bf16.mxu0 %vm2504_vm0, %v2503_v0 }
 0x906   :  { %2257 = vmatprep.subr.bf16.mxu0 %v2503_v0 }
 0x9cb   :  { %v2845_v47 = vpop.f32.mrb[36].mxu1 }
 0x9cc   :  { %v2219_v48 = vpop.f32.mrb[37].mxu1 }
 0x9cd   :  { %v1182_v51 = vpop.f32.mrb[38].mxu1 }
 0x9ce   :  { %v2220_v52 = vpop.f32.mrb[39].mxu1 }
 0x9cf   :  { %v2847_v53 = vpop.f32.mrb[40].mxu0 }
 0x9d0   :  { %v2225_v54 = vpop.f32.mrb[41].mxu0 }
 0x9d1   :  { %v1230_v55 = vpop.f32.mrb[42].mxu0 }
 0x9d2   :  { %v2226_v57 = vpop.f32.mrb[43].mxu0 }
 0x9d3   :  { %v1281_v58 = vpop.f32.mrb[40].mxu1 }
 0x9d4   :  { %v2231_v61 = vpop.f32.mrb[41].mxu1  ;;  %v1337_v63 = vsel %vm235_vm4, %v1281_v58, -inf }
 0x9d5   :  { %1338 = vmax.xlane.f32.xlu1 %v1337_v63  ;;  %v1284_v1 = vpop.f32.mrb[42].mxu1 }
 0x9d6   :  { %v2232_v3 = vpop.f32.mrb[43].mxu1 }
 0x9d7   :  { %v1331_v5 = vpop.f32.mrb[44].mxu0 }
 0x9d8   :  { %v2237_v6 = vpop.f32.mrb[45].mxu0  ;;  %v1340_v7 = vsel %vm235_vm4, %v1331_v5, -inf }
 0x9d9   :  { %1341 = vmax.xlane.f32.xlu0 %v1340_v7  ;;  %v1334_v8 = vpop.f32.mrb[46].mxu0 }
 0x9da   :  { %v2238_v9 = vpop.f32.mrb[47].mxu0 }
 0x9e6   :  { %1459 = vrot.lane.b32.xlu1 %v2621_v14, %s2521_s19 }
 0x9ea   :  { %1457 = vrot.lane.b32.xlu1 %v2621_v14, %s2522_s20 }
 0x9ee   :  { %1625 = vrot.lane.b32.xlu1 %v2624_v17, %s2523_s21 }
 0x9ef   :  { %1509 = vrot.lane.b32.xlu0 %v2624_v17, %s2521_s19 }
 0x9f3   :  { %1507 = vrot.lane.b32.xlu0 %v2624_v17, %s2522_s20 }
 0x9f7   :  { %1577 = vrot.lane.b32.xlu0 %v2621_v14, %s2523_s21 }
 0xa62   :  { %v1339_v10 = vpop.xlane.xlu1 %1338 }
 0xa63   :  { %v1343_v11 = vsub.f32 %v1281_v58, %v1339_v10 }
 0xa65   :  { %v1345_v13 = vmul.f32 1.442695, %v1343_v11 }
 0xa66   :  { %v1342_v15 = vpop.xlane.xlu0 %1341  ;;  %v1460_v23 = vpop.permute.xlu1 %1459 }
 0xa67   :  { %2358 = vpow2.f32 %v1345_v13  ;;  %v1344_v16 = vsub.f32 %v1331_v5, %v1342_v15  ;;  %v1465_v27 = vsel %vm140_vm2, %v1460_v23, 0 }
 0xa69   :  { %v1347_v19 = vmul.f32 1.442695, %v1344_v16 }
 0xa6a   :  { %v1510_v21 = vpop.permute.xlu0 %1509  ;;  %v1458_v31 = vpop.permute.xlu1 %1457 }
 0xa6b   :  { %2360 = vpow2.f32 %v1347_v19  ;;  %v1515_v32 = vsel %vm140_vm2, %v1510_v21, 0 }
 0xa6e   :  { %v1508_v26 = vpop.permute.xlu0 %1507  ;;  %v1626_v38 = vpop.permute.xlu1 %1625 }
 0xa6f   :  { %v1631_v39 = vsel %vm261_vm3, %v1626_v38, 0 }
 0xa71   :  { %v2857_v22 = vpop.eup %2358 }
 0xa72   :  { %v1355_v24 = vpack.c.bf16 %v2857_v22, %v2857_v22  ;;  %v1578_v34 = vpop.permute.xlu0 %1577 }
 0xa73   :  { %v1583_v35 = vsel %vm261_vm3, %v1578_v34, 0 }
 0xa74   :  { %2242 = vmatmul.mubr.msk.bf16.vlgmr.msra.gmra.mrb[44].mxu1 %vm235_vm4, %v1355_v24 }
 0xa75   :  { %v2863_v28 = vpop.eup %2360  ;;  %2252 = vmatpush3.bf16.xpose.msra.mxu1 %v1465_v27  ;;  %2253 = vmatprep.mubr.msk.bf16.mxu1 %vm2504_vm0, %v2503_v0 }
 0xa76   :  { %v1356_v29 = vpack.c.bf16 %v2863_v28, %v2863_v28  ;;  %2263 = vmatprep.subr.bf16.mxu1 %v2503_v0 }
 0xa78   :  { %2248 = vmatmul.mubr.msk.bf16.vlgmr.msra.gmra.mrb[48].mxu0 %vm235_vm4, %v1356_v29 }
 0xa79   :  { %2258 = vmatpush3.bf16.xpose.msra.mxu0 %v1515_v32  ;;  %2259 = vmatprep.mubr.msk.bf16.mxu0 %vm2504_vm0, %v2503_v0 }
 0xa7a   :  { %2269 = vmatprep.subr.bf16.mxu0 %v2503_v0 }
 0xa7c   :  { %2254 = vmatmul.mubr.msk.bf16.vlgmr.msra.gmra.mrb[48].mxu1 %vm140_vm2, %v1458_v31 }
 0xa7d   :  { %2264 = vmatpush3.bf16.msra.mxu1 %v1583_v35  ;;  %2265 = vmatprep.mubr.msk.bf16.mxu1 %vm2504_vm0, %v2503_v0 }
 0xa7e   :  { %2275 = vmatprep.subr.bf16.mxu1 %v2503_v0 }
 0xa80   :  { %2260 = vmatmul.mubr.msk.bf16.vlgmr.msra.gmra.mrb[52].mxu0 %vm140_vm2, %v1508_v26 }
 0xa81   :  { %2270 = vmatpush3.bf16.msra.mxu0 %v1631_v39  ;;  %2271 = vmatprep.mubr.msk.bf16.mxu0 %vm2504_vm0, %v2503_v0 }
 0xa82   :  { %2281 = vmatprep.subr.bf16.mxu0 %v2503_v0 }
 0xb47   :  { %v2885_v40 = vpop.f32.mrb[44].mxu1 }
 0xb48   :  { %v2243_v41 = vpop.f32.mrb[45].mxu1 }
 0xb49   :  { %v1402_v42 = vpop.f32.mrb[46].mxu1 }
 0xb4a   :  { %v2244_v44 = vpop.f32.mrb[47].mxu1 }
 0xb4b   :  { %v2887_v46 = vpop.f32.mrb[48].mxu0 }
 0xb4c   :  { %v2249_v48 = vpop.f32.mrb[49].mxu0 }
 0xb4d   :  { %v1450_v51 = vpop.f32.mrb[50].mxu0 }
 0xb4e   :  { %v2250_v52 = vpop.f32.mrb[51].mxu0 }
 0xb4f   :  { %v1501_v54 = vpop.f32.mrb[48].mxu1 }
 0xb50   :  { %v2255_v55 = vpop.f32.mrb[49].mxu1  ;;  %v1557_v57 = vsel %vm235_vm4, %v1501_v54, -inf }
 0xb51   :  { %1558 = vmax.xlane.f32.xlu1 %v1557_v57  ;;  %v1504_v58 = vpop.f32.mrb[50].mxu1 }
 0xb52   :  { %v2256_v61 = vpop.f32.mrb[51].mxu1 }
 0xb53   :  { %v1551_v63 = vpop.f32.mrb[52].mxu0 }
 0xb54   :  { %v2261_v1 = vpop.f32.mrb[53].mxu0  ;;  %v1560_v3 = vsel %vm235_vm4, %v1551_v63, -inf }
 0xb55   :  { %1561 = vmax.xlane.f32.xlu0 %v1560_v3  ;;  %v1554_v5 = vpop.f32.mrb[54].mxu0  ;;  %v469_v1 = vsel %vm235_vm4, %v2697_v20, 0.0  ;;  %v692_v3 = vsel %vm235_vm4, %v2743_v4, 0.0  ;;  %v909_v20 = vsel %vm235_vm4, %v2777_v43, 0.0  ;;  %v1129_v4 = vsel %vm235_vm4, %v2817_v30, 0.0 }
 0xb56   :  { %v2262_v6 = vpop.f32.mrb[55].mxu0  ;;  %v472_v5 = vsel %vm235_vm4, %v2703_v25, 0.0  ;;  %v1352_v25 = vsel %vm235_vm4, %v2863_v28, 0.0 }
 0xb57   :  { %v912_v6 = vsel %vm235_vm4, %v2783_v50, 0.0  ;;  %v1349_v50 = vsel %vm235_vm4, %v2857_v22, 0.0 }
 0xb62   :  { %1679 = vrot.lane.b32.xlu1 %v2621_v14, %s2524_s22 }
 0xb66   :  { %1677 = vrot.lane.b32.xlu1 %v2621_v14, %s2525_s23 }
 0xb6b   :  { %1729 = vrot.lane.b32.xlu0 %v2624_v17, %s2524_s22 }
 0xb6f   :  { %1727 = vrot.lane.b32.xlu0 %v2624_v17, %s2525_s23 }
 0xbde   :  { %v1559_v7 = vpop.xlane.xlu1 %1558 }
 0xbdf   :  { %v1563_v8 = vsub.f32 %v1501_v54, %v1559_v7 }
 0xbe1   :  { %v1565_v9 = vmul.f32 1.442695, %v1563_v8 }
 0xbe2   :  { %v1562_v10 = vpop.xlane.xlu0 %1561  ;;  %v1680_v16 = vpop.permute.xlu1 %1679 }
 0xbe3   :  { %2362 = vpow2.f32 %v1565_v9  ;;  %v1564_v11 = vsub.f32 %v1551_v63, %v1562_v10  ;;  %v1685_v21 = vsel %vm140_vm2, %v1680_v16, 0 }
 0xbe5   :  { %v1567_v13 = vmul.f32 1.442695, %v1564_v11 }
 0xbe6   :  { %v1730_v24 = vpop.permute.xlu0 %1729  ;;  %v1678_v29 = vpop.permute.xlu1 %1677 }
 0xbe7   :  { %2364 = vpow2.f32 %v1567_v13  ;;  %v1735_v27 = vsel %vm140_vm2, %v1730_v24, 0 }
 0xbea   :  { %v1728_v31 = vpop.permute.xlu0 %1727 }
 0xbed   :  { %v2895_v15 = vpop.eup %2362 }
 0xbee   :  { %v1575_v19 = vpack.c.bf16 %v2895_v15, %v2895_v15  ;;  %v1569_v43 = vsel %vm235_vm4, %v2895_v15, 0.0 }
 0xbf0   :  { %2266 = vmatmul.mubr.msk.bf16.vlgmr.msra.gmra.mrb[52].mxu1 %vm235_vm4, %v1575_v19 }
 0xbf1   :  { %v2365_v23 = vpop.eup %2364  ;;  %2276 = vmatpush3.bf16.xpose.msra.mxu1 %v1685_v21  ;;  %2277 = vmatprep.mubr.msk.bf16.mxu1 %vm2504_vm0, %v2503_v0 }
 0xbf2   :  { %v1576_v26 = vpack.c.bf16 %v2365_v23, %v2365_v23  ;;  %2287 = vmatprep.subr.bf16.mxu1 %v2503_v0 }
 0xbf4   :  { %2272 = vmatmul.mubr.msk.bf16.vlgmr.msra.gmra.mrb[56].mxu0 %vm235_vm4, %v1576_v26 }
 0xbf5   :  { %2282 = vmatpush3.bf16.xpose.msra.mxu0 %v1735_v27  ;;  %2283 = vmatprep.mubr.msk.bf16.mxu0 %vm2504_vm0, %v2503_v0  ;;  %v251_v27 = vsel %vm235_vm4, %v2663_v49, 0.0 }
 0xbf6   :  { %2293 = vmatprep.subr.bf16.mxu0 %v2503_v0 }
 0xbf8   :  { %2278 = vmatmul.mubr.msk.bf16.vlgmr.msra.gmra.mrb[56].mxu1 %vm140_vm2, %v1678_v29 }
 0xbf9   :  { %2289 = vmatprep.mubr.msk.bf16.mxu1 %vm2504_vm0, %v2503_v0 }
 0xbfc   :  { %2284 = vmatmul.mubr.msk.bf16.vlgmr.msra.gmra.mrb[60].mxu0 %vm140_vm2, %v1728_v31 }
 0xbfd   :  { %2295 = vmatprep.mubr.msk.bf16.mxu0 %vm2504_vm0, %v2503_v0 }
 0xcc3   :  { %v2915_v32 = vpop.f32.mrb[52].mxu1 }
 0xcc4   :  { %v2267_v34 = vpop.f32.mrb[53].mxu1 }
 0xcc5   :  { %v1622_v35 = vpop.f32.mrb[54].mxu1 }
 0xcc6   :  { %v2268_v38 = vpop.f32.mrb[55].mxu1 }
 0xcc7   :  { %v2917_v39 = vpop.f32.mrb[56].mxu0 }
 0xcc8   :  { %v2273_v41 = vpop.f32.mrb[57].mxu0 }
 0xcc9   :  { %v1670_v42 = vpop.f32.mrb[58].mxu0 }
 0xcca   :  { %v2274_v44 = vpop.f32.mrb[59].mxu0 }
 0xccb   :  { %v1721_v48 = vpop.f32.mrb[56].mxu1 }
 0xccc   :  { %v2279_v51 = vpop.f32.mrb[57].mxu1  ;;  %v1777_v52 = vsel %vm235_vm4, %v1721_v48, -inf }
 0xccd   :  { %1778 = vmax.xlane.f32.xlu1 %v1777_v52  ;;  %v1724_v54 = vpop.f32.mrb[58].mxu1 }
 0xcce   :  { %v2280_v55 = vpop.f32.mrb[59].mxu1 }
 0xccf   :  { %v1771_v57 = vpop.f32.mrb[60].mxu0 }
 0xcd0   :  { %v2285_v58 = vpop.f32.mrb[61].mxu0  ;;  %v1780_v0 = vsel %vm235_vm4, %v1771_v57, -inf }
 0xcd1   :  { %1781 = vmax.xlane.f32.xlu0 %v1780_v0  ;;  %v1774_v61 = vpop.f32.mrb[62].mxu0 }
 0xcd2   :  { %v2286_v63 = vpop.f32.mrb[63].mxu0 }
 0xcde   :  { %1845 = vrot.lane.b32.xlu1 %v2624_v17, %s2526_s24  ;;  %v689_v17 = vsel %vm235_vm4, %v2737_v62, 0.0  ;;  %v1572_v62 = vsel %vm235_vm4, %v2365_v23, 0.0  ;;  %v248_v23 = vsel %vm235_vm4, %v2657_v45, 0.0 }
 0xce7   :  { %1797 = vrot.lane.b32.xlu0 %v2621_v14, %s2526_s24  ;;  %v1132_v14 = vsel %vm235_vm4, %v2823_v36, 0.0 }
 0xd02   :  { %470 = vadd.xlane.f32.xlu1 %v469_v1 }
 0xd06   :  { %693 = vadd.xlane.f32.xlu1 %v692_v3  ;;  %473 = vadd.xlane.f32.xlu0 %v472_v5 }
 0xd0a   :  { %913 = vadd.xlane.f32.xlu1 %v912_v6  ;;  %690 = vadd.xlane.f32.xlu0 %v689_v17 }
 0xd0e   :  { %1133 = vadd.xlane.f32.xlu1 %v1132_v14  ;;  %910 = vadd.xlane.f32.xlu0 %v909_v20 }
 0xd12   :  { %1353 = vadd.xlane.f32.xlu1 %v1352_v25  ;;  %1130 = vadd.xlane.f32.xlu0 %v1129_v4 }
 0xd16   :  { %1573 = vadd.xlane.f32.xlu1 %v1572_v62  ;;  %1350 = vadd.xlane.f32.xlu0 %v1349_v50 }
 0xd1a   :  { %1570 = vadd.xlane.f32.xlu0 %v1569_v43 }
 0xd5a   :  { %v1779_v36 = vpop.xlane.xlu1 %1778 }
 0xd5b   :  { %v1783_v7 = vsub.f32 %v1721_v48, %v1779_v36 }
 0xd5d   :  { %v1785_v8 = vmul.f32 1.442695, %v1783_v7 }
 0xd5e   :  { %v1846_v28 = vpop.permute.xlu1 %1845  ;;  %v1782_v9 = vpop.xlane.xlu0 %1781 }
 0xd5f   :  { %2366 = vpow2.f32 %v1785_v8  ;;  %v1851_v30 = vsel %vm261_vm3, %v1846_v28, 0  ;;  %v1784_v10 = vsub.f32 %v1771_v57, %v1782_v9 }
 0xd60   :  { %2294 = vmatpush3.bf16.msra.mxu0 %v1851_v30 }
 0xd61   :  { %v1787_v11 = vmul.f32 1.442695, %v1784_v10 }
 0xd62   :  { %v1798_v13 = vpop.permute.xlu0 %1797 }
 0xd63   :  { %2368 = vpow2.f32 %v1787_v11  ;;  %v1803_v22 = vsel %vm261_vm3, %v1798_v13, 0 }
 0xd64   :  { %2288 = vmatpush3.bf16.msra.mxu1 %v1803_v22 }
 0xd69   :  { %v2367_v16 = vpop.eup %2366 }
 0xd6a   :  { %v1789_v15 = vsel %vm235_vm4, %v2367_v16, 0.0  ;;  %v1795_v19 = vpack.c.bf16 %v2367_v16, %v2367_v16 }
 0xd6b   :  { %1790 = vadd.xlane.f32.xlu0 %v1789_v15 }
 0xd6c   :  { %2290 = vmatmul.mubr.msk.bf16.vlgmr.msra.gmra.mrb[60].mxu1 %vm235_vm4, %v1795_v19 }
 0xd6d   :  { %v2369_v21 = vpop.eup %2368 }
 0xd6e   :  { %v1792_v24 = vsel %vm235_vm4, %v2369_v21, 0.0  ;;  %v1796_v26 = vpack.c.bf16 %v2369_v21, %v2369_v21 }
 0xd6f   :  { %249 = vadd.xlane.f32.xlu0 %v248_v23  ;;  %1793 = vadd.xlane.f32.xlu1 %v1792_v24 }
 0xd70   :  { %2296 = vmatmul.mubr.msk.bf16.vlgmr.msra.gmra.mrb[64].mxu0 %vm235_vm4, %v1796_v26 }
 0xd73   :  { %252 = vadd.xlane.f32.xlu1 %v251_v27 }
 0xd8f   :  { %v471_v29 = vpop.xlane.xlu1 %470 }
 0xd90   :  { %2370 = vrcp.f32 %v471_v29 }
 0xd93   :  { %v694_v31 = vpop.xlane.xlu1 %693  ;;  %v474_v34 = vpop.xlane.xlu0 %473 }
 0xd94   :  { %2372 = vrcp.f32 %v694_v31 }
 0xd95   :  { %2374 = vrcp.f32 %v474_v34 }
 0xd97   :  { %v914_v35 = vpop.xlane.xlu1 %913  ;;  %v691_v38 = vpop.xlane.xlu0 %690 }
 0xd98   :  { %2376 = vrcp.f32 %v914_v35 }
 0xd99   :  { %2378 = vrcp.f32 %v691_v38 }
 0xd9a   :  { %v2371_v45 = vpop.eup %2370 }
 0xd9b   :  { %v1134_v41 = vpop.xlane.xlu1 %1133  ;;  %v911_v42 = vpop.xlane.xlu0 %910  ;;  %v575_v44 = vmul.f32 %v2371_v45, %v2725_v33 }
 0xd9c   :  { %2380 = vrcp.f32 %v1134_v41 }
 0xd9d   :  { %2382 = vrcp.f32 %v911_v42  ;;  %1899 = vrot.lane.b32.xlu0 %v575_v44, %s2502_s18 }
 0xd9e   :  { %v2373_v49 = vpop.eup %2372 }
 0xd9f   :  { %v2375_v48 = vpop.eup %2374  ;;  %v1354_v51 = vpop.xlane.xlu1 %1353  ;;  %v796_v54 = vmul.f32 %v2373_v49, %v2767_v18 }
 0xda0   :  { %v1131_v52 = vpop.xlane.xlu0 %1130  ;;  %2384 = vrcp.f32 %v1354_v51  ;;  %v576_v55 = vmul.f32 %v2375_v48, %v2727_v37 }
 0xda1   :  { %2386 = vrcp.f32 %v1131_v52  ;;  %1909 = vrot.lane.b32.xlu0 %v796_v54, %s2499_s11 }
 0xda2   :  { %v2377_v57 = vpop.eup %2376  ;;  %1901 = vrot.lane.b32.xlu1 %v576_v55, %s2502_s18  ;;  %s2528_s18 = smov 16  }
 0xda3   :  { %v2379_v33 = vpop.eup %2378  ;;  %v1574_v58 = vpop.xlane.xlu1 %1573  ;;  %v1016_v61 = vmul.f32 %v2377_v57, %v2807_v2 }
 0xda4   :  { %v1351_v0 = vpop.xlane.xlu0 %1350  ;;  %2388 = vrcp.f32 %v1574_v58  ;;  %v795_v63 = vmul.f32 %v2379_v33, %v2765_v12 }
 0xda5   :  { %2390 = vrcp.f32 %v1351_v0  ;;  %1917 = vrot.lane.b32.xlu0 %v1016_v61, %s2527_s0 }
 0xda6   :  { %v2381_v18 = vpop.eup %2380  ;;  %1907 = vrot.lane.b32.xlu1 %v795_v63, %s2499_s11 }
 0xda7   :  { %v2383_v37 = vpop.eup %2382  ;;  %v1236_v3 = vmul.f32 %v2381_v18, %v2847_v53 }
 0xda8   :  { %v1571_v1 = vpop.xlane.xlu0 %1570  ;;  %v1015_v5 = vmul.f32 %v2383_v37, %v2805_v59 }
 0xda9   :  { %2392 = vrcp.f32 %v1571_v1  ;;  %1925 = vrot.lane.b32.xlu0 %v1236_v3, %s2528_s18 }
 0xdaa   :  { %v2385_v6 = vpop.eup %2384  ;;  %1915 = vrot.lane.b32.xlu1 %v1015_v5, %s2527_s0 }
 0xdab   :  { %v2387_v2 = vpop.eup %2386  ;;  %v1456_v12 = vmul.f32 %v2385_v6, %v2887_v46 }
 0xdac   :  { %v1235_v17 = vmul.f32 %v2387_v2, %v2845_v47 }
 0xdad   :  { %1933 = vrot.lane.b32.xlu0 %v1456_v12, %s2529_s25 }
 0xdae   :  { %v2389_v14 = vpop.eup %2388  ;;  %1923 = vrot.lane.b32.xlu1 %v1235_v17, %s2528_s18 }
 0xdaf   :  { %v2391_v20 = vpop.eup %2390  ;;  %v1676_v25 = vmul.f32 %v2389_v14, %v2917_v39 }
 0xdb0   :  { %v1455_v53 = vmul.f32 %v2391_v20, %v2885_v40 }
 0xdb1   :  { %1941 = vrot.lane.b32.xlu0 %v1676_v25, %s2530_s26 }
 0xdb2   :  { %1931 = vrot.lane.b32.xlu1 %v1455_v53, %s2529_s25 }
 0xdb3   :  { %v2393_v59 = vpop.eup %2392 }
 0xdb4   :  { %v1675_v4 = vmul.f32 %v2393_v59, %v2915_v32 }
 0xdb6   :  { %1939 = vrot.lane.b32.xlu1 %v1675_v4, %s2530_s26 }
 0xdf8   :  { %v1791_v62 = vpop.xlane.xlu0 %1790 }
 0xdf9   :  { %2394 = vrcp.f32 %v1791_v62 }
 0xdfc   :  { %v1794_v46 = vpop.xlane.xlu1 %1793  ;;  %v250_v11 = vpop.xlane.xlu0 %249 }
 0xdfd   :  { %2396 = vrcp.f32 %v1794_v46 }
 0xdfe   :  { %2398 = vrcp.f32 %v250_v11 }
 0xe00   :  { %v253_v10 = vpop.xlane.xlu1 %252 }
 0xe01   :  { %2400 = vrcp.f32 %v253_v10 }
 0xe03   :  { %v2395_v47 = vpop.eup %2394 }
 0xe07   :  { %v2397_v40 = vpop.eup %2396 }
 0xe08   :  { %v2399_v26 = vpop.eup %2398 }
 0xe09   :  { %v355_v31 = vmul.f32 %v2399_v26, %v2685_v56 }
 0xe0b   :  { %v2401_v29 = vpop.eup %2400 }
 0xe0c   :  { %v356_v38 = vmul.f32 %v2401_v29, %v2687_v60 }
 0xe0f   :  { %v1900_v22 = vpop.permute.xlu0 %1899 }
 0xe10   :  { %v1953_v35 = vsel %vm140_vm2, %v355_v31, %v1900_v22 }
 0xe13   :  { %v1910_v15 = vpop.permute.xlu0 %1909 }
 0xe14   :  { %v1902_v13 = vpop.permute.xlu1 %1901 }
 0xe15   :  { %v1954_v42 = vsel %vm140_vm2, %v356_v38, %v1902_v13 }
 0xe16   :  { %v1956_v56 = vsel %vm235_vm4, %v1954_v42, %v1910_v15 }
 0xe17   :  { %v1918_v21 = vpop.permute.xlu0 %1917 }
 0xe18   :  { %v1908_v16 = vpop.permute.xlu1 %1907  ;;  %v1959_v55 = vsel %vm1957_vm5, %v1956_v56, %v1918_v21 }
 0xe19   :  { %v1955_v45 = vsel %vm235_vm4, %v1953_v35, %v1908_v16 }
 0xe1b   :  { %v1926_v24 = vpop.permute.xlu0 %1925 }
 0xe1c   :  { %v1916_v19 = vpop.permute.xlu1 %1915  ;;  %v1962_v57 = vsel %vm1960_vm6, %v1959_v55, %v1926_v24 }
 0xe1d   :  { %v1958_v44 = vsel %vm1957_vm5, %v1955_v45, %v1916_v19 }
 0xe1f   :  { %v1934_v34 = vpop.permute.xlu0 %1933 }
 0xe20   :  { %v1924_v23 = vpop.permute.xlu1 %1923  ;;  %v1965_v33 = vsel %vm1963_vm7, %v1962_v57, %v1934_v34 }
 0xe21   :  { %v1961_v49 = vsel %vm1960_vm6, %v1958_v44, %v1924_v23 }
 0xe23   :  { %v1942_v51 = vpop.permute.xlu0 %1941 }
 0xe24   :  { %v1932_v27 = vpop.permute.xlu1 %1931  ;;  %v1968_v58 = vsel %vm1966_vm9, %v1965_v33, %v1942_v51 }
 0xe25   :  { %v1964_v48 = vsel %vm1963_vm7, %v1961_v49, %v1932_v27 }
 0xe28   :  { %v1940_v41 = vpop.permute.xlu1 %1939 }
 0xe29   :  { %v1967_v52 = vsel %vm1966_vm9, %v1964_v48, %v1940_v41 }
 0xe3f   :  { %v1839_v50 = vpop.f32.mrb[60].mxu1 }
 0xe40   :  { %v1895_v43 = vmul.f32 %v2395_v47, %v1839_v50  ;;  %v2291_v36 = vpop.f32.mrb[61].mxu1 }
 0xe41   :  { %v1842_v7 = vpop.f32.mrb[62].mxu1 }
 0xe42   :  { %v2292_v8 = vpop.f32.mrb[63].mxu1  ;;  %1947 = vrot.lane.b32.xlu1 %v1895_v43, %s2531_s2 }
 0xe43   :  { %v1887_v39 = vpop.f32.mrb[64].mxu0 }
 0xe44   :  { %v1896_v28 = vmul.f32 %v2397_v40, %v1887_v39  ;;  %v2297_v9 = vpop.f32.mrb[65].mxu0 }
 0xe45   :  { %v1890_v30 = vpop.f32.mrb[66].mxu0 }
 0xe46   :  { %1949 = vrot.lane.b32.xlu0 %v1896_v28, %s2531_s2  ;;  %v2298_v32 = vpop.f32.mrb[67].mxu0 }
 0xeb4   :  { %v1948_v54 = vpop.permute.xlu1 %1947 }
 0xeb5   :  { %v1970_v60 = vsel %vm1969_vm8, %v1967_v52, %v1948_v54 }
 0xeb6   :  { %1972 = vst.msk [vmem:[#allocation8] sm:$0xff] %vm87_vm1, %v1970_v60 }
 0xeb8   :  { %v1950_v0 = vpop.permute.xlu0 %1949 }
 0xeb9   :  { %v1971_v61 = vsel %vm1969_vm8, %v1968_v58, %v1950_v0 }
 0xeba   :  { %1973 = vst.msk [vmem:[#allocation8 + $0x8] sm:$0xff] %vm87_vm1, %v1971_v61 }
 0xebb   :  { %2479 = shalt.err (!%p2476_p0)
}
 0xebc   :  { %s2480_s5 = scalar_lea.hbm %s3001_s4, 256 }
 0xebd   :  { %p2481_p1 = scmp.ne.s32.totalorder %s3001_s4, %s2480_s5  ;;  %p2484_p2 = scmp.lt.u32.totalorder %s2480_s5, %s3001_s4 }
 0xebf   :  { %p2486_p3 = pnand %p2484_p2, %p2481_p1 }
 0xec1   :  { %2489 = shalt.err (!%p2486_p3)
}
 0xec2   :  { %1985 = dma.vmem_to_hbm [thread:$0]  %s1980_s28, 256, %s3001_s4, [#allocation4], %s2498_s1, %s2498_s1, %s2499_s11  }
 0xec3   :  { %2494 = dma.done.wait [#allocation4], 256  }
 0xec4   :  { %2495 = vsyncadd [#allocation4], 4294967040 }
 0xec5   :  { %1989 = vsyncpa [#allocation3], 1 }
 0xec6   :  { %1990 = vsyncpa [#allocation6], 1 }
 0xec7   :  { %1991 = vsyncpa [#allocation4], 1 }

</bundles_post_ra>
